<compile_context>
chip_gen: v5e
topology: v5e:2x2
jax: 0.10.0
libtpu: 0.0.40
codegen_flags: <defaults>
</compile_context>

<pallas_src>
import jax
import jax.numpy as jnp
import numpy as np
from jax import lax
from jax.experimental import pallas as pl
from jax.experimental.pallas import tpu as pltpu


def _linear(x, w):
    # x: (M, in), w: (out, in)  ->  (M, out)   (== torch.nn.functional.linear, no bias)
    return lax.dot_general(x, w, (((1,), (1,)), ((), ())),
                           preferred_element_type=jnp.float32)


def _attn_kernel(q_ref, seq_ref, seq_e_ref, seq_t_ref, mask_ref, src_ref,
                 wq_ref, wk_s_ref, wk_e_ref, wk_t_ref,
                 fc_s_ref, fc_e_ref, fc_t_ref,
                 ln_w_ref, ln_b_ref, w1a_ref, w1b_ref, w2_ref,
                 out_ref, attn_ref):
    # per-block activations
    q = q_ref[...]                           # (TB, dm)   query = [src | 0 | src_t]
    src = src_ref[...]                       # (TB, D)
    mask = mask_ref[...]                     # (TB, N, 1) 1.0 == null entry

    # weights (small, read once per invocation)
    wq = wq_ref[...]                         # (1, dm)
    wk_s = wk_s_ref[...][:, None, :]         # (1, 1, D)
    wk_e = wk_e_ref[...][:, None, :]         # (1, 1, De)
    wk_t = wk_t_ref[...][:, None, :]         # (1, 1, Dt)

    # ---- attention logits: F.linear(cat([q, k]), shared_attn) == q.wq + k.wk ----
    # VPU reduces (no M=1 / out-dim-1 MXU work); neighbor axis stays on sublanes.
    score_q = jnp.sum(q * wq, axis=-1, keepdims=True)[:, :, None]          # (TB, 1, 1)
    score_k = (jnp.sum(seq_ref[...] * wk_s, axis=-1, keepdims=True)
               + jnp.sum(seq_e_ref[...] * wk_e, axis=-1, keepdims=True)
               + jnp.sum(seq_t_ref[...] * wk_t, axis=-1, keepdims=True))   # (TB, N, 1)
    logits = score_k + score_q
    logits = jnp.where(mask > 0.5, jnp.float32(-1e10), logits)             # masked_fill

    # ---- masked softmax over the neighbor axis ----
    m = jnp.max(logits, axis=1, keepdims=True)                             # (TB, 1, 1)
    e = jnp.exp(logits - m)
    attn = e / jnp.sum(e, axis=1, keepdims=True)                           # (TB, N, 1)

    # ---- output = bmm(attn, v) with v == k, computed per feature group (VPU) ----
    o_s = jnp.sum(attn * seq_ref[...], axis=1)                             # (TB, D)
    o_e = jnp.sum(attn * seq_e_ref[...], axis=1)                           # (TB, De)
    o_t = jnp.sum(attn * seq_t_ref[...], axis=1)                           # (TB, Dt)

    # ---- fc_w projection (MXU, fc_w split over its input columns), residual, LN ----
    fc_out = (_linear(o_s, fc_s_ref[...])
              + _linear(o_e, fc_e_ref[...])
              + _linear(o_t, fc_t_ref[...]))                               # (TB, dm)
    y = fc_out + q
    mu = jnp.mean(y, axis=-1, keepdims=True)
    d = y - mu
    var = jnp.mean(d * d, axis=-1, keepdims=True)
    y = d * lax.rsqrt(var + 1e-5) * ln_w_ref[...] + ln_b_ref[...]          # (TB, dm)

    # ---- aggregation MLP: relu([y, src] @ W1^T) @ W2^T (concat avoided via W1 split) ----
    h = jnp.maximum(_linear(y, w1a_ref[...]) + _linear(src, w1b_ref[...]), 0.0)
    out_ref[...] = _linear(h, w2_ref[...])                                 # (TB, D)
    attn_ref[...] = attn                                                   # (TB, N, 1)


def attn_model_forward(src, src_t, seq, seq_t, seq_e, mask, params, *, block_b=128):
    """Pallas implementation of AttnModel.forward (attn_mode='simple').

    src   : (B, D)      src_t : (B, 1, Dt)
    seq   : (B, N, D)   seq_t : (B, N, Dt)   seq_e : (B, N, De)
    mask  : (B, N) bool (True == null entry)
    returns (output (B, D), attn (B, N))
    """
    f32 = jnp.float32
    B, D = src.shape
    N = seq.shape[1]
    De = seq_e.shape[-1]
    Dt = src_t.shape[-1]
    dm = D + De + Dt                      # model_dim = feat + edge + time (De == D)

    # ---- batch tiling: TB rows per grid step (multiple of 8 sublanes), and try to
    #      keep >= 2 grid steps so both v7x TensorCores get work via "parallel". ----
    half = -(-B // 2)
    TB = min(block_b, max(8, -(-half // 8) * 8))
    B_pad = -(-B // TB) * TB
    pad = B_pad - B

    # glue (tiny per-row concat for q, mask cast, padding) stays in plain JAX;
    # the large k = concat([seq, seq_e, seq_t]) is never materialized.
    src_f = src.astype(f32)
    src_t2 = src_t.reshape(B, Dt).astype(f32)
    q = jnp.concatenate([src_f, jnp.zeros((B, De), f32), src_t2], axis=-1)  # (B, dm)
    mask3 = mask.astype(f32)[:, :, None]                                    # (B, N, 1)
    seq_f, seq_e_f, seq_t_f = (x.astype(f32) for x in (seq, seq_e, seq_t))

    if pad:
        q = jnp.pad(q, ((0, pad), (0, 0)))
        src_f = jnp.pad(src_f, ((0, pad), (0, 0)))
        seq_f = jnp.pad(seq_f, ((0, pad), (0, 0), (0, 0)))
        seq_e_f = jnp.pad(seq_e_f, ((0, pad), (0, 0), (0, 0)))
        seq_t_f = jnp.pad(seq_t_f, ((0, pad), (0, 0), (0, 0)))
        # padded rows are fully masked -> harmless uniform softmax, sliced off below
        mask3 = jnp.pad(mask3, ((0, pad), (0, 0), (0, 0)), constant_values=1.0)

    # ---- parameter plumbing (pure slicing; no compute, no HBM round trips) ----
    shared = params['shared_attn'].astype(f32)            # (1, 2*dm)
    wq = shared[:, :dm]
    wk = shared[:, dm:]
    wk_s, wk_e, wk_t = wk[:, :D], wk[:, D:D + De], wk[:, D + De:]
    fc_w = params['fc_w'].astype(f32)                     # (dm, dm)
    fc_s, fc_e, fc_t = fc_w[:, :D], fc_w[:, D:D + De], fc_w[:, D + De:]
    ln_w = params['ln_w'].astype(f32)[None, :]            # (1, dm)
    ln_b = params['ln_b'].astype(f32)[None, :]            # (1, dm)
    w1 = params['agg_fc_w1'].astype(f32)                  # (H1, dm + D)
    w1a, w1b = w1[:, :dm], w1[:, dm:]
    w2 = params['agg_fc_w2'].astype(f32)                  # (D, H1)
    H1 = w1.shape[0]

    row2 = lambda b: (b, 0)
    row3 = lambda b: (b, 0, 0)
    const2 = lambda b: (0, 0)

    grid_spec = pltpu.PrefetchScalarGridSpec(
        num_scalar_prefetch=0,
        grid=(B_pad // TB,),
        in_specs=[
            pl.BlockSpec((TB, dm), row2),        # q
            pl.BlockSpec((TB, N, D), row3),      # seq
            pl.BlockSpec((TB, N, De), row3),     # seq_e
            pl.BlockSpec((TB, N, Dt), row3),     # seq_t
            pl.BlockSpec((TB, N, 1), row3),      # mask (float, 1 == null)
            pl.BlockSpec((TB, D), row2),         # src
            pl.BlockSpec((1, dm), const2),       # wq
            pl.BlockSpec((1, D), const2),        # wk (feat cols)
            pl.BlockSpec((1, De), const2),       # wk (edge cols)
            pl.BlockSpec((1, Dt), const2),       # wk (time cols)
            pl.BlockSpec((dm, D), const2),       # fc_w[:, :D]
            pl.BlockSpec((dm, De), const2),      # fc_w[:, D:D+De]
            pl.BlockSpec((dm, Dt), const2),      # fc_w[:, D+De:]
            pl.BlockSpec((1, dm), const2),       # layer-norm weight
            pl.BlockSpec((1, dm), const2),       # layer-norm bias
            pl.BlockSpec((H1, dm), const2),      # agg_fc_w1[:, :dm]
            pl.BlockSpec((H1, D), const2),       # agg_fc_w1[:, dm:]
            pl.BlockSpec((D, H1), const2),       # agg_fc_w2
        ],
        out_specs=[
            pl.BlockSpec((TB, D), row2),
            pl.BlockSpec((TB, N, 1), row3),
        ],
    )

    out, attn = pl.pallas_call(
        _attn_kernel,
        out_shape=(jax.ShapeDtypeStruct((B_pad, D), f32),
                   jax.ShapeDtypeStruct((B_pad, N, 1), f32)),
        grid_spec=grid_spec,
        compiler_params=pltpu.CompilerParams(dimension_semantics=("parallel",)),
    )(q, seq_f, seq_e_f, seq_t_f, mask3, src_f,
      wq, wk_s, wk_e, wk_t, fc_s, fc_e, fc_t, ln_w, ln_b, w1a, w1b, w2)

    return out[:B], attn[:B, :, 0]


def reference_forward(src, src_t, seq, seq_t, seq_e, mask, params):
    """Pure-JAX replica of the PyTorch forward, for verification."""
    D = src.shape[-1]
    dm = D + seq_e.shape[-1] + src_t.shape[-1]
    q = jnp.concatenate(
        [src[:, None, :], jnp.zeros_like(src[:, None, :]), src_t], axis=2)
    k = jnp.concatenate([seq, seq_e, seq_t], axis=2)
    w = params['shared_attn'][0]
    logits = (jnp.einsum('bd,d->b', q[:, 0, :], w[:dm])[:, None]
              + jnp.einsum('bnd,d->bn', k, w[dm:]))
    logits = jnp.where(mask, -1e10, logits)
    attn = jax.nn.softmax(logits, axis=-1)
    out = jnp.einsum('bn,bnd->bd', attn, k)
    out = out @ params['fc_w'].T
    y = out + q[:, 0, :]
    mu = jnp.mean(y, axis=-1, keepdims=True)
    var = jnp.mean((y - mu) ** 2, axis=-1, keepdims=True)
    y = (y - mu) / jnp.sqrt(var + 1e-5) * params['ln_w'] + params['ln_b']
    x = jnp.concatenate([y, src], axis=1)
    h = jax.nn.relu(x @ params['agg_fc_w1'].T)
    return h @ params['agg_fc_w2'].T, attn


def init_params(key, feat_dim, edge_dim, time_dim, hidden):
    dm = feat_dim + edge_dim + time_dim
    k1, k2, k3, k4 = jax.random.split(key, 4)
    return {
        'shared_attn': 0.1 * jax.random.normal(k1, (1, 2 * dm), jnp.float32),
        'fc_w':        0.1 * jax.random.normal(k2, (dm, dm), jnp.float32),
        'agg_fc_w1':   0.1 * jax.random.normal(k3, (hidden, dm + feat_dim), jnp.float32),
        'agg_fc_w2':   0.1 * jax.random.normal(k4, (feat_dim, hidden), jnp.float32),
        'ln_w':        jnp.ones((dm,), jnp.float32),    # nn.LayerNorm default weight
        'ln_b':        jnp.zeros((dm,), jnp.float32),   # nn.LayerNorm default bias
    }


if __name__ == "__main__":
    feat_dim = edge_dim = time_dim = 16        # model_dim = 48
    hidden = feat_dim                          # agg MLP hidden size
    # NOTE: dropout in the reference module is defined but never applied in forward.

    key = jax.random.PRNGKey(0)
    kp, kd = jax.random.split(key)
    params = init_params(kp, feat_dim, edge_dim, time_dim, hidden)

    def make_inputs(k, B, N):
        ks, kst, kq, kqt, kqe, kl = jax.random.split(k, 6)
        src = jax.random.normal(ks, (B, feat_dim), jnp.float32)
        src_t = jax.random.normal(kst, (B, 1, time_dim), jnp.float32)
        seq = jax.random.normal(kq, (B, N, feat_dim), jnp.float32)
        seq_t = jax.random.normal(kqt, (B, N, time_dim), jnp.float32)
        seq_e = jax.random.normal(kqe, (B, N, edge_dim), jnp.float32)
        lens = jax.random.randint(kl, (B,), 1, N + 1)          # valid-neighbor counts
        mask = jnp.arange(N)[None, :] >= lens[:, None]         # True == null entry
        return src, src_t, seq, seq_t, seq_e, mask

    # small case (single grid step) and a larger case exercising padding + multi-step grid
    for (B, N) in ((4, 8), (260, 8)):
        inputs = make_inputs(jax.random.fold_in(kd, B), B, N)
        out, attn = attn_model_forward(*inputs, params)
        out = jax.block_until_ready(out)
        attn = jax.block_until_ready(attn)

        ref_out, ref_attn = reference_forward(*inputs, params)
        np.testing.assert_allclose(np.asarray(out), np.asarray(ref_out),
                                   rtol=1e-3, atol=1e-3)
        np.testing.assert_allclose(np.asarray(attn), np.asarray(ref_attn),
                                   rtol=1e-3, atol=1e-3)
        assert out.shape == (B, feat_dim) and attn.shape == (B, N)

    print("KERNEL_OK")
</pallas_src>

<mosaic_0001>
module attributes {stable_mosaic.version = 11 : i64} {
  func.func @_attn_kernel(%arg0: i32, %arg1: memref<8x48xf32, #tpu.memory_space<vmem>>, %arg2: memref<8x8x16xf32, #tpu.memory_space<vmem>>, %arg3: memref<8x8x16xf32, #tpu.memory_space<vmem>>, %arg4: memref<8x8x16xf32, #tpu.memory_space<vmem>>, %arg5: memref<8x8x1xf32, #tpu.memory_space<vmem>>, %arg6: memref<8x16xf32, #tpu.memory_space<vmem>>, %arg7: memref<1x48xf32, #tpu.memory_space<vmem>>, %arg8: memref<1x16xf32, #tpu.memory_space<vmem>>, %arg9: memref<1x16xf32, #tpu.memory_space<vmem>>, %arg10: memref<1x16xf32, #tpu.memory_space<vmem>>, %arg11: memref<48x16xf32, #tpu.memory_space<vmem>>, %arg12: memref<48x16xf32, #tpu.memory_space<vmem>>, %arg13: memref<48x16xf32, #tpu.memory_space<vmem>>, %arg14: memref<1x48xf32, #tpu.memory_space<vmem>>, %arg15: memref<1x48xf32, #tpu.memory_space<vmem>>, %arg16: memref<16x48xf32, #tpu.memory_space<vmem>>, %arg17: memref<16x16xf32, #tpu.memory_space<vmem>>, %arg18: memref<16x16xf32, #tpu.memory_space<vmem>>, %arg19: memref<8x16xf32, #tpu.memory_space<vmem>>, %arg20: memref<8x8x1xf32, #tpu.memory_space<vmem>>) attributes {dimension_semantics = [#tpu.dimension_semantics<parallel>], iteration_bounds = array<i64: 1>, scalar_prefetch = 0 : i64, scratch_operands = 0 : i64, tpu.core_type = #tpu.core_type<tc>, window_params = [{transform_indices = @transform_0, window_bounds = array<i64: 8, 48>}, {transform_indices = @transform_1, window_bounds = array<i64: 8, 8, 16>}, {transform_indices = @transform_2, window_bounds = array<i64: 8, 8, 16>}, {transform_indices = @transform_3, window_bounds = array<i64: 8, 8, 16>}, {transform_indices = @transform_4, window_bounds = array<i64: 8, 8, 1>}, {transform_indices = @transform_5, window_bounds = array<i64: 8, 16>}, {pipeline_mode = #tpu.pipeline_mode<synchronous>, transform_indices = @transform_6, window_bounds = array<i64: 1, 48>}, {pipeline_mode = #tpu.pipeline_mode<synchronous>, transform_indices = @transform_7, window_bounds = array<i64: 1, 16>}, {pipeline_mode = #tpu.pipeline_mode<synchronous>, transform_indices = @transform_8, window_bounds = array<i64: 1, 16>}, {pipeline_mode = #tpu.pipeline_mode<synchronous>, transform_indices = @transform_9, window_bounds = array<i64: 1, 16>}, {pipeline_mode = #tpu.pipeline_mode<synchronous>, transform_indices = @transform_10, window_bounds = array<i64: 48, 16>}, {pipeline_mode = #tpu.pipeline_mode<synchronous>, transform_indices = @transform_11, window_bounds = array<i64: 48, 16>}, {pipeline_mode = #tpu.pipeline_mode<synchronous>, transform_indices = @transform_12, window_bounds = array<i64: 48, 16>}, {pipeline_mode = #tpu.pipeline_mode<synchronous>, transform_indices = @transform_13, window_bounds = array<i64: 1, 48>}, {pipeline_mode = #tpu.pipeline_mode<synchronous>, transform_indices = @transform_14, window_bounds = array<i64: 1, 48>}, {pipeline_mode = #tpu.pipeline_mode<synchronous>, transform_indices = @transform_15, window_bounds = array<i64: 16, 48>}, {pipeline_mode = #tpu.pipeline_mode<synchronous>, transform_indices = @transform_16, window_bounds = array<i64: 16, 16>}, {pipeline_mode = #tpu.pipeline_mode<synchronous>, transform_indices = @transform_17, window_bounds = array<i64: 16, 16>}, {transform_indices = @transform_18, window_bounds = array<i64: 8, 16>}, {transform_indices = @transform_19, window_bounds = array<i64: 8, 8, 1>}]} {
    %c0 = arith.constant 0 : index
    %c0_0 = arith.constant 0 : index
    %0 = vector.load %arg1[%c0, %c0_0] : memref<8x48xf32, #tpu.memory_space<vmem>>, vector<8x48xf32>
    %c0_1 = arith.constant 0 : index
    %c0_2 = arith.constant 0 : index
    %1 = vector.load %arg6[%c0_1, %c0_2] : memref<8x16xf32, #tpu.memory_space<vmem>>, vector<8x16xf32>
    %c0_3 = arith.constant 0 : index
    %c0_4 = arith.constant 0 : index
    %c0_5 = arith.constant 0 : index
    %2 = vector.load %arg5[%c0_3, %c0_4, %c0_5] : memref<8x8x1xf32, #tpu.memory_space<vmem>>, vector<8x8x1xf32>
    %c0_6 = arith.constant 0 : index
    %c0_7 = arith.constant 0 : index
    %3 = vector.load %arg7[%c0_6, %c0_7] : memref<1x48xf32, #tpu.memory_space<vmem>>, vector<1x48xf32>
    %c0_8 = arith.constant 0 : index
    %c0_9 = arith.constant 0 : index
    %4 = vector.load %arg8[%c0_8, %c0_9] : memref<1x16xf32, #tpu.memory_space<vmem>>, vector<1x16xf32>
    %5 = vector.shape_cast %4 : vector<1x16xf32> to vector<1x1x16xf32>
    %c0_10 = arith.constant 0 : index
    %c0_11 = arith.constant 0 : index
    %6 = vector.load %arg9[%c0_10, %c0_11] : memref<1x16xf32, #tpu.memory_space<vmem>>, vector<1x16xf32>
    %7 = vector.shape_cast %6 : vector<1x16xf32> to vector<1x1x16xf32>
    %c0_12 = arith.constant 0 : index
    %c0_13 = arith.constant 0 : index
    %8 = vector.load %arg10[%c0_12, %c0_13] : memref<1x16xf32, #tpu.memory_space<vmem>>, vector<1x16xf32>
    %9 = vector.shape_cast %8 : vector<1x16xf32> to vector<1x1x16xf32>
    %10 = vector.broadcast %3 : vector<1x48xf32> to vector<8x48xf32>
    %11 = arith.mulf %0, %10 : vector<8x48xf32>
    %cst = arith.constant dense<0.000000e+00> : vector<8xf32>
    %12 = vector.multi_reduction <add>, %11, %cst [1] : vector<8x48xf32> to vector<8xf32>
    %13 = vector.shape_cast %12 : vector<8xf32> to vector<8x1xf32>
    %14 = vector.shape_cast %13 : vector<8x1xf32> to vector<8x1x1xf32>
    %c0_14 = arith.constant 0 : index
    %c0_15 = arith.constant 0 : index
    %c0_16 = arith.constant 0 : index
    %15 = vector.load %arg2[%c0_14, %c0_15, %c0_16] : memref<8x8x16xf32, #tpu.memory_space<vmem>>, vector<8x8x16xf32>
    %16 = vector.broadcast %5 : vector<1x1x16xf32> to vector<8x8x16xf32>
    %17 = arith.mulf %15, %16 : vector<8x8x16xf32>
    %cst_17 = arith.constant dense<0.000000e+00> : vector<8x8xf32>
    %18 = vector.multi_reduction <add>, %17, %cst_17 [2] : vector<8x8x16xf32> to vector<8x8xf32>
    %19 = vector.shape_cast %18 : vector<8x8xf32> to vector<8x8x1xf32>
    %c0_18 = arith.constant 0 : index
    %c0_19 = arith.constant 0 : index
    %c0_20 = arith.constant 0 : index
    %20 = vector.load %arg3[%c0_18, %c0_19, %c0_20] : memref<8x8x16xf32, #tpu.memory_space<vmem>>, vector<8x8x16xf32>
    %21 = vector.broadcast %7 : vector<1x1x16xf32> to vector<8x8x16xf32>
    %22 = arith.mulf %20, %21 : vector<8x8x16xf32>
    %cst_21 = arith.constant dense<0.000000e+00> : vector<8x8xf32>
    %23 = vector.multi_reduction <add>, %22, %cst_21 [2] : vector<8x8x16xf32> to vector<8x8xf32>
    %24 = vector.shape_cast %23 : vector<8x8xf32> to vector<8x8x1xf32>
    %25 = arith.addf %19, %24 : vector<8x8x1xf32>
    %c0_22 = arith.constant 0 : index
    %c0_23 = arith.constant 0 : index
    %c0_24 = arith.constant 0 : index
    %26 = vector.load %arg4[%c0_22, %c0_23, %c0_24] : memref<8x8x16xf32, #tpu.memory_space<vmem>>, vector<8x8x16xf32>
    %27 = vector.broadcast %9 : vector<1x1x16xf32> to vector<8x8x16xf32>
    %28 = arith.mulf %26, %27 : vector<8x8x16xf32>
    %cst_25 = arith.constant dense<0.000000e+00> : vector<8x8xf32>
    %29 = vector.multi_reduction <add>, %28, %cst_25 [2] : vector<8x8x16xf32> to vector<8x8xf32>
    %30 = vector.shape_cast %29 : vector<8x8xf32> to vector<8x8x1xf32>
    %31 = arith.addf %25, %30 : vector<8x8x1xf32>
    %32 = vector.broadcast %14 : vector<8x1x1xf32> to vector<8x8x1xf32>
    %33 = arith.addf %31, %32 : vector<8x8x1xf32>
    %cst_26 = arith.constant 5.000000e-01 : f32
    %34 = vector.broadcast %cst_26 : f32 to vector<8x8x1xf32>
    %35 = arith.cmpf ogt, %2, %34 : vector<8x8x1xf32>
    %cst_27 = arith.constant -1.000000e+10 : f32
    %36 = vector.broadcast %cst_27 : f32 to vector<8x8x1xf32>
    %37 = arith.select %35, %36, %33 : vector<8x8x1xi1>, vector<8x8x1xf32>
    %cst_28 = arith.constant dense<0xFF800000> : vector<8x1xf32>
    %38 = vector.multi_reduction <maximumf>, %37, %cst_28 [1] : vector<8x8x1xf32> to vector<8x1xf32>
    %39 = vector.shape_cast %38 : vector<8x1xf32> to vector<8x1x1xf32>
    %40 = vector.broadcast %39 : vector<8x1x1xf32> to vector<8x8x1xf32>
    %41 = arith.subf %37, %40 : vector<8x8x1xf32>
    %42 = math.exp %41 : vector<8x8x1xf32>
    %cst_29 = arith.constant dense<0.000000e+00> : vector<8x1xf32>
    %43 = vector.multi_reduction <add>, %42, %cst_29 [1] : vector<8x8x1xf32> to vector<8x1xf32>
    %44 = vector.shape_cast %43 : vector<8x1xf32> to vector<8x1x1xf32>
    %45 = vector.broadcast %44 : vector<8x1x1xf32> to vector<8x8x1xf32>
    %46 = arith.divf %42, %45 : vector<8x8x1xf32>
    %c0_30 = arith.constant 0 : index
    %c0_31 = arith.constant 0 : index
    %c0_32 = arith.constant 0 : index
    %47 = vector.load %arg2[%c0_30, %c0_31, %c0_32] : memref<8x8x16xf32, #tpu.memory_space<vmem>>, vector<8x8x16xf32>
    %48 = vector.broadcast %46 : vector<8x8x1xf32> to vector<8x8x16xf32>
    %49 = arith.mulf %48, %47 : vector<8x8x16xf32>
    %cst_33 = arith.constant dense<0.000000e+00> : vector<8x16xf32>
    %50 = vector.multi_reduction <add>, %49, %cst_33 [1] : vector<8x8x16xf32> to vector<8x16xf32>
    %c0_34 = arith.constant 0 : index
    %c0_35 = arith.constant 0 : index
    %c0_36 = arith.constant 0 : index
    %51 = vector.load %arg3[%c0_34, %c0_35, %c0_36] : memref<8x8x16xf32, #tpu.memory_space<vmem>>, vector<8x8x16xf32>
    %52 = vector.broadcast %46 : vector<8x8x1xf32> to vector<8x8x16xf32>
    %53 = arith.mulf %52, %51 : vector<8x8x16xf32>
    %cst_37 = arith.constant dense<0.000000e+00> : vector<8x16xf32>
    %54 = vector.multi_reduction <add>, %53, %cst_37 [1] : vector<8x8x16xf32> to vector<8x16xf32>
    %c0_38 = arith.constant 0 : index
    %c0_39 = arith.constant 0 : index
    %c0_40 = arith.constant 0 : index
    %55 = vector.load %arg4[%c0_38, %c0_39, %c0_40] : memref<8x8x16xf32, #tpu.memory_space<vmem>>, vector<8x8x16xf32>
    %56 = vector.broadcast %46 : vector<8x8x1xf32> to vector<8x8x16xf32>
    %57 = arith.mulf %56, %55 : vector<8x8x16xf32>
    %cst_41 = arith.constant dense<0.000000e+00> : vector<8x16xf32>
    %58 = vector.multi_reduction <add>, %57, %cst_41 [1] : vector<8x8x16xf32> to vector<8x16xf32>
    %c0_42 = arith.constant 0 : index
    %c0_43 = arith.constant 0 : index
    %59 = vector.load %arg11[%c0_42, %c0_43] : memref<48x16xf32, #tpu.memory_space<vmem>>, vector<48x16xf32>
    %cst_44 = arith.constant dense<0.000000e+00> : vector<8x48xf32>
    %60 = tpu.matmul %50, %59, %cst_44 {dimension_numbers = #tpu.dot_dimension_numbers<[1], [1], [0], [0], [0, 0, 1, 0], [], []>} : vector<8x16xf32>, vector<48x16xf32>, vector<8x48xf32> -> vector<8x48xf32>
    %c0_45 = arith.constant 0 : index
    %c0_46 = arith.constant 0 : index
    %61 = vector.load %arg12[%c0_45, %c0_46] : memref<48x16xf32, #tpu.memory_space<vmem>>, vector<48x16xf32>
    %cst_47 = arith.constant dense<0.000000e+00> : vector<8x48xf32>
    %62 = tpu.matmul %54, %61, %cst_47 {dimension_numbers = #tpu.dot_dimension_numbers<[1], [1], [0], [0], [0, 0, 1, 0], [], []>} : vector<8x16xf32>, vector<48x16xf32>, vector<8x48xf32> -> vector<8x48xf32>
    %63 = arith.addf %60, %62 : vector<8x48xf32>
    %c0_48 = arith.constant 0 : index
    %c0_49 = arith.constant 0 : index
    %64 = vector.load %arg13[%c0_48, %c0_49] : memref<48x16xf32, #tpu.memory_space<vmem>>, vector<48x16xf32>
    %cst_50 = arith.constant dense<0.000000e+00> : vector<8x48xf32>
    %65 = tpu.matmul %58, %64, %cst_50 {dimension_numbers = #tpu.dot_dimension_numbers<[1], [1], [0], [0], [0, 0, 1, 0], [], []>} : vector<8x16xf32>, vector<48x16xf32>, vector<8x48xf32> -> vector<8x48xf32>
    %66 = arith.addf %63, %65 : vector<8x48xf32>
    %67 = arith.addf %66, %0 : vector<8x48xf32>
    %cst_51 = arith.constant dense<0.000000e+00> : vector<8xf32>
    %68 = vector.multi_reduction <add>, %67, %cst_51 [1] : vector<8x48xf32> to vector<8xf32>
    %69 = vector.shape_cast %68 : vector<8xf32> to vector<8x1xf32>
    %cst_52 = arith.constant 4.800000e+01 : f32
    %70 = vector.broadcast %cst_52 : f32 to vector<8x1xf32>
    %71 = arith.divf %69, %70 : vector<8x1xf32>
    %72 = vector.broadcast %71 : vector<8x1xf32> to vector<8x48xf32>
    %73 = arith.subf %67, %72 : vector<8x48xf32>
    %74 = arith.mulf %73, %73 : vector<8x48xf32>
    %cst_53 = arith.constant dense<0.000000e+00> : vector<8xf32>
    %75 = vector.multi_reduction <add>, %74, %cst_53 [1] : vector<8x48xf32> to vector<8xf32>
    %76 = vector.shape_cast %75 : vector<8xf32> to vector<8x1xf32>
    %cst_54 = arith.constant 4.800000e+01 : f32
    %77 = vector.broadcast %cst_54 : f32 to vector<8x1xf32>
    %78 = arith.divf %76, %77 : vector<8x1xf32>
    %cst_55 = arith.constant 9.99999974E-6 : f32
    %79 = vector.broadcast %cst_55 : f32 to vector<8x1xf32>
    %80 = arith.addf %78, %79 : vector<8x1xf32>
    %81 = math.rsqrt %80 : vector<8x1xf32>
    %82 = vector.broadcast %81 : vector<8x1xf32> to vector<8x48xf32>
    %83 = arith.mulf %73, %82 : vector<8x48xf32>
    %c0_56 = arith.constant 0 : index
    %c0_57 = arith.constant 0 : index
    %84 = vector.load %arg14[%c0_56, %c0_57] : memref<1x48xf32, #tpu.memory_space<vmem>>, vector<1x48xf32>
    %85 = vector.broadcast %84 : vector<1x48xf32> to vector<8x48xf32>
    %86 = arith.mulf %83, %85 : vector<8x48xf32>
    %c0_58 = arith.constant 0 : index
    %c0_59 = arith.constant 0 : index
    %87 = vector.load %arg15[%c0_58, %c0_59] : memref<1x48xf32, #tpu.memory_space<vmem>>, vector<1x48xf32>
    %88 = vector.broadcast %87 : vector<1x48xf32> to vector<8x48xf32>
    %89 = arith.addf %86, %88 : vector<8x48xf32>
    %c0_60 = arith.constant 0 : index
    %c0_61 = arith.constant 0 : index
    %90 = vector.load %arg16[%c0_60, %c0_61] : memref<16x48xf32, #tpu.memory_space<vmem>>, vector<16x48xf32>
    %cst_62 = arith.constant dense<0.000000e+00> : vector<8x16xf32>
    %91 = tpu.matmul %89, %90, %cst_62 {dimension_numbers = #tpu.dot_dimension_numbers<[1], [1], [0], [0], [0, 0, 1, 0], [], []>} : vector<8x48xf32>, vector<16x48xf32>, vector<8x16xf32> -> vector<8x16xf32>
    %c0_63 = arith.constant 0 : index
    %c0_64 = arith.constant 0 : index
    %92 = vector.load %arg17[%c0_63, %c0_64] : memref<16x16xf32, #tpu.memory_space<vmem>>, vector<16x16xf32>
    %cst_65 = arith.constant dense<0.000000e+00> : vector<8x16xf32>
    %93 = tpu.matmul %1, %92, %cst_65 {dimension_numbers = #tpu.dot_dimension_numbers<[1], [1], [0], [0], [0, 0, 1, 0], [], []>} : vector<8x16xf32>, vector<16x16xf32>, vector<8x16xf32> -> vector<8x16xf32>
    %94 = arith.addf %91, %93 : vector<8x16xf32>
    %cst_66 = arith.constant 0.000000e+00 : f32
    %95 = vector.broadcast %cst_66 : f32 to vector<8x16xf32>
    %96 = arith.maximumf %94, %95 : vector<8x16xf32>
    %c0_67 = arith.constant 0 : index
    %c0_68 = arith.constant 0 : index
    %97 = vector.load %arg18[%c0_67, %c0_68] : memref<16x16xf32, #tpu.memory_space<vmem>>, vector<16x16xf32>
    %cst_69 = arith.constant dense<0.000000e+00> : vector<8x16xf32>
    %98 = tpu.matmul %96, %97, %cst_69 {dimension_numbers = #tpu.dot_dimension_numbers<[1], [1], [0], [0], [0, 0, 1, 0], [], []>} : vector<8x16xf32>, vector<16x16xf32>, vector<8x16xf32> -> vector<8x16xf32>
    %c0_70 = arith.constant 0 : index
    %c0_71 = arith.constant 0 : index
    %99 = vector.load %arg19[%c0_70, %c0_71] : memref<8x16xf32, #tpu.memory_space<vmem>>, vector<8x16xf32>
    tpu.vector_store %arg19[%c0_70, %c0_71], %98 {strides = array<i32>} : memref<8x16xf32, #tpu.memory_space<vmem>>, vector<8x16xf32>,
    %c0_72 = arith.constant 0 : index
    %c0_73 = arith.constant 0 : index
    %c0_74 = arith.constant 0 : index
    %100 = vector.load %arg20[%c0_72, %c0_73, %c0_74] : memref<8x8x1xf32, #tpu.memory_space<vmem>>, vector<8x8x1xf32>
    tpu.vector_store %arg20[%c0_72, %c0_73, %c0_74], %46 {strides = array<i32>} : memref<8x8x1xf32, #tpu.memory_space<vmem>>, vector<8x8x1xf32>,
    return
  }
  func.func @transform_0(%arg0: i32) -> (i32, i32) {
    %c0_i32 = arith.constant 0 : i32
    %c0_i32_0 = arith.constant 0 : i32
    return %arg0, %c0_i32 : i32, i32
  }
  func.func @transform_1(%arg0: i32) -> (i32, i32, i32) {
    %c0_i32 = arith.constant 0 : i32
    %c0_i32_0 = arith.constant 0 : i32
    %c0_i32_1 = arith.constant 0 : i32
    return %arg0, %c0_i32, %c0_i32_0 : i32, i32, i32
  }
  func.func @transform_2(%arg0: i32) -> (i32, i32, i32) {
    %c0_i32 = arith.constant 0 : i32
    %c0_i32_0 = arith.constant 0 : i32
    %c0_i32_1 = arith.constant 0 : i32
    return %arg0, %c0_i32, %c0_i32_0 : i32, i32, i32
  }
  func.func @transform_3(%arg0: i32) -> (i32, i32, i32) {
    %c0_i32 = arith.constant 0 : i32
    %c0_i32_0 = arith.constant 0 : i32
    %c0_i32_1 = arith.constant 0 : i32
    return %arg0, %c0_i32, %c0_i32_0 : i32, i32, i32
  }
  func.func @transform_4(%arg0: i32) -> (i32, i32, i32) {
    %c0_i32 = arith.constant 0 : i32
    %c0_i32_0 = arith.constant 0 : i32
    %c0_i32_1 = arith.constant 0 : i32
    return %arg0, %c0_i32, %c0_i32_0 : i32, i32, i32
  }
  func.func @transform_5(%arg0: i32) -> (i32, i32) {
    %c0_i32 = arith.constant 0 : i32
    %c0_i32_0 = arith.constant 0 : i32
    return %arg0, %c0_i32 : i32, i32
  }
  func.func @transform_6(%arg0: i32) -> (i32, i32) {
    %c0_i32 = arith.constant 0 : i32
    %c0_i32_0 = arith.constant 0 : i32
    %c0_i32_1 = arith.constant 0 : i32
    return %c0_i32, %c0_i32_0 : i32, i32
  }
  func.func @transform_7(%arg0: i32) -> (i32, i32) {
    %c0_i32 = arith.constant 0 : i32
    %c0_i32_0 = arith.constant 0 : i32
    %c0_i32_1 = arith.constant 0 : i32
    return %c0_i32, %c0_i32_0 : i32, i32
  }
  func.func @transform_8(%arg0: i32) -> (i32, i32) {
    %c0_i32 = arith.constant 0 : i32
    %c0_i32_0 = arith.constant 0 : i32
    %c0_i32_1 = arith.constant 0 : i32
    return %c0_i32, %c0_i32_0 : i32, i32
  }
  func.func @transform_9(%arg0: i32) -> (i32, i32) {
    %c0_i32 = arith.constant 0 : i32
    %c0_i32_0 = arith.constant 0 : i32
    %c0_i32_1 = arith.constant 0 : i32
    return %c0_i32, %c0_i32_0 : i32, i32
  }
  func.func @transform_10(%arg0: i32) -> (i32, i32) {
    %c0_i32 = arith.constant 0 : i32
    %c0_i32_0 = arith.constant 0 : i32
    %c0_i32_1 = arith.constant 0 : i32
    return %c0_i32, %c0_i32_0 : i32, i32
  }
  func.func @transform_11(%arg0: i32) -> (i32, i32) {
    %c0_i32 = arith.constant 0 : i32
    %c0_i32_0 = arith.constant 0 : i32
    %c0_i32_1 = arith.constant 0 : i32
    return %c0_i32, %c0_i32_0 : i32, i32
  }
  func.func @transform_12(%arg0: i32) -> (i32, i32) {
    %c0_i32 = arith.constant 0 : i32
    %c0_i32_0 = arith.constant 0 : i32
    %c0_i32_1 = arith.constant 0 : i32
    return %c0_i32, %c0_i32_0 : i32, i32
  }
  func.func @transform_13(%arg0: i32) -> (i32, i32) {
    %c0_i32 = arith.constant 0 : i32
    %c0_i32_0 = arith.constant 0 : i32
    %c0_i32_1 = arith.constant 0 : i32
    return %c0_i32, %c0_i32_0 : i32, i32
  }
  func.func @transform_14(%arg0: i32) -> (i32, i32) {
    %c0_i32 = arith.constant 0 : i32
    %c0_i32_0 = arith.constant 0 : i32
    %c0_i32_1 = arith.constant 0 : i32
    return %c0_i32, %c0_i32_0 : i32, i32
  }
  func.func @transform_15(%arg0: i32) -> (i32, i32) {
    %c0_i32 = arith.constant 0 : i32
    %c0_i32_0 = arith.constant 0 : i32
    %c0_i32_1 = arith.constant 0 : i32
    return %c0_i32, %c0_i32_0 : i32, i32
  }
  func.func @transform_16(%arg0: i32) -> (i32, i32) {
    %c0_i32 = arith.constant 0 : i32
    %c0_i32_0 = arith.constant 0 : i32
    %c0_i32_1 = arith.constant 0 : i32
    return %c0_i32, %c0_i32_0 : i32, i32
  }
  func.func @transform_17(%arg0: i32) -> (i32, i32) {
    %c0_i32 = arith.constant 0 : i32
    %c0_i32_0 = arith.constant 0 : i32
    %c0_i32_1 = arith.constant 0 : i32
    return %c0_i32, %c0_i32_0 : i32, i32
  }
  func.func @transform_18(%arg0: i32) -> (i32, i32) {
    %c0_i32 = arith.constant 0 : i32
    %c0_i32_0 = arith.constant 0 : i32
    return %arg0, %c0_i32 : i32, i32
  }
  func.func @transform_19(%arg0: i32) -> (i32, i32, i32) {
    %c0_i32 = arith.constant 0 : i32
    %c0_i32_0 = arith.constant 0 : i32
    %c0_i32_1 = arith.constant 0 : i32
    return %arg0, %c0_i32, %c0_i32_0 : i32, i32, i32
  }
}

</mosaic_0001>

<bundles_post_ra>
// kernel: tpu_custom_call.1
= control target key start
LH: loop header
LB: loop body
LE: loop exit
PB: predicated region body
PF: predicated region fallthrough
CT: control target
= control target key end

     0   :  { %s2060_s0 = inlined_call_operand.hbm [shape: f32[8,48], index: 0, kind: input, shape index: {}]   ;;  %s2061_s1 = inlined_call_operand.vmem [shape: f32[8,8,16], index: 1, kind: input, shape index: {}]   ;;  %s2062_s2 = inlined_call_operand.vmem [shape: f32[8,8,16], index: 2, kind: input, shape index: {}]   ;;  %s2063_s3 = inlined_call_operand.vmem [shape: f32[8,8,16], index: 3, kind: input, shape index: {}]   ;;  %s2064_s4 = inlined_call_operand.vmem [shape: f32[8,8,1], index: 4, kind: input, shape index: {}]   ;;  %s2065_s5 = inlined_call_operand.hbm [shape: f32[8,16], index: 5, kind: input, shape index: {}]   ;;  %s2066_s6 = inlined_call_operand.vmem [shape: f32[1,48], index: 6, kind: input, shape index: {}]   ;;  %s2067_s7 = inlined_call_operand.vmem [shape: f32[1,16], index: 7, kind: input, shape index: {}]   ;;  %s2068_s8 = inlined_call_operand.vmem [shape: f32[1,16], index: 8, kind: input, shape index: {}]   ;;  %s2069_s9 = inlined_call_operand.vmem [shape: f32[1,16], index: 9, kind: input, shape index: {}]   ;;  %s2070_s10 = inlined_call_operand.vmem [shape: f32[48,16], index: 10, kind: input, shape index: {}]   ;;  %s2071_s11 = inlined_call_operand.vmem [shape: f32[48,16], index: 11, kind: input, shape index: {}]   ;;  %s2072_s12 = inlined_call_operand.vmem [shape: f32[48,16], index: 12, kind: input, shape index: {}]   ;;  %s2073_s13 = inlined_call_operand.vmem [shape: f32[1,48], index: 13, kind: input, shape index: {}]   ;;  %s2074_s14 = inlined_call_operand.vmem [shape: f32[1,48], index: 14, kind: input, shape index: {}]   ;;  %s2075_s15 = inlined_call_operand.vmem [shape: f32[16,48], index: 15, kind: input, shape index: {}]   ;;  %s2076_s16 = inlined_call_operand.vmem [shape: f32[16,16], index: 16, kind: input, shape index: {}]   ;;  %s2077_s17 = inlined_call_operand.hbm [shape: f32[16,16], index: 17, kind: input, shape index: {}]   ;;  %s2078_s18 = inlined_call_operand.hbm [shape: f32[8,16], index: 18, kind: output, shape index: {0}]   ;;  %s2079_s19 = inlined_call_operand.vmem [shape: f32[8,8,1], index: 19, kind: output, shape index: {1}]  }
   0x1   :  { %2083 = sst [smem:[#allocation12_spill]] %s2060_s0 }
   0x2   :  { %2084 = sst [smem:[#allocation13_spill]] %s2061_s1 }
   0x3   :  { %2085 = sst [smem:[#allocation14_spill]] %s2062_s2 }
   0x4   :  { %2086 = sst [smem:[#allocation15_spill]] %s2063_s3 }
   0x5   :  { %25 = vsyncpa [#allocation3], 0 }
   0x6   :  { %26 = vsyncpa [#allocation6], 0  ;;  %s52_s20 = sshll.u32 %s2065_s5, 4  ;;  %s53_s20 = int_to_ptr.hbm [resolvable:$true] %s52_s20 }
   0x7   :  { %27 = vsyncpa [#allocation4], 0  ;;  %s1356_s21 = smov [#allocation5]   ;;  %s2087_s23 = sld [smem:[#allocation12_spill]] }
   0x8   :  { %s54_s1 = sshll.u32 %s1356_s21, 4  ;;  %s1357_s25 = smov [#allocation2]   ;;  %s55_s1 = int_to_ptr.vmem [resolvable:$true] %s54_s1 }
   0x9   :  { %57 = dma.hbm_to_vmem [thread:$0]  %s53_s20, 128, %s55_s1, [#allocation6]  }
   0xa   :  { %s35_s3 = sshll.u32 %s1357_s25, 4  ;;  %s84_s28 = sshll.u32 %s2077_s17, 4  ;;  %s36_s3 = int_to_ptr.vmem [resolvable:$true] %s35_s3  ;;  %s85_s28 = int_to_ptr.hbm [resolvable:$true] %s84_s28 }
   0xb   :  { %s1358_s5 = smov [#allocation7]   ;;  %s1359_s0 = smov 128  }
   0xc   :  { %s86_s29 = sshll.u32 %s1358_s5, 4  ;;  %s1360_s30 = smov 8   ;;  %s87_s29 = int_to_ptr.vmem [resolvable:$true] %s86_s29 }
   0xd   :  { %s33_s24 = sshll.u32 %s2087_s23, 4  ;;  %s34_s24 = int_to_ptr.hbm [resolvable:$true] %s33_s24 }
   0xe   :  { %38 = dma.hbm_to_vmem [thread:$0]  %s34_s24, 128, %s36_s3, [#allocation3]  }
   0xf   :  { %92 = dma.hbm_to_vmem [thread:$0]  %s85_s28, 256, %s87_s29, [#allocation6], %s1359_s0, %s1359_s0, %s1360_s30  }
  0x10   :  { %1350 = dma.done.wait [#allocation3], 128  }
  0x11   :  { %1351 = vsyncadd [#allocation3], 4294967168 }
  0x12   :  { %1352 = dma.done.wait [#allocation6], 384  }
  0x13   :  { %1353 = vsyncadd [#allocation6], 4294966912  ;;  %s2088_s1 = sld [smem:[#allocation14_spill]]  ;;  %v1481_v1 = vld [vmem:[%s2068_s8] ss:$0 sm:$0xff]  ;;  %vm163_vm0 = vcmask 130048  }
  0x14   :  { %s2089_s24 = sld [smem:[#allocation13_spill]]  ;;  %v1489_v3 = vld [vmem:[%s2067_s7] ss:$0 sm:$0xff]  ;;  %vm123_vm1 = vcmask 392192   ;;  %vm314_vm3 = vcmask 7168  }
  0x15   :  { %v1202_v21 = vld [vmem:[%s2066_s6] ss:$0 sm:$0xff]  ;;  %s2090_s26 = sld [smem:[#allocation15_spill]] }
  0x16   :  { %v105_v23 = vld [vmem:[#allocation2] sm:$0xff] }
  0x17   :  { %v122_v26 = vmul.f32 %v1202_v21, %v105_v23  ;;  %v1546_v28 = vld [vmem:[%s2069_s9] ss:$0 sm:$0xff] }
  0x19   :  { %v1476_v0 = vld [vmem:[%s2088_s1] sm:$0xff]  ;;  %v1504_v8 = vld [vmem:[%s2088_s1 + $0x8] sm:$0xff]  ;;  %v190_v10 = vld [vmem:[%s2088_s1 + $0x10] sm:$0xff]  ;;  %v124_v30 = vsel %vm123_vm1, %v122_v26, 0.0 }
  0x1a   :  { %v146_v2 = vld [vmem:[%s2089_s24 + $0x10] sm:$0xff]  ;;  %v199_v4 = vmul.f32 %v1481_v1, %v1476_v0  ;;  %v1496_v5 = vld [vmem:[%s2089_s24] sm:$0xff]  ;;  %v1513_v11 = vld [vmem:[%s2089_s24 + $0x8] sm:$0xff]  ;;  %v200_v14 = vmul.f32 %v1481_v1, %v1504_v8  ;;  %v201_v15 = vmul.f32 %v1481_v1, %v190_v10 }
  0x1b   :  { %v157_v6 = vmul.f32 %v1489_v3, %v146_v2  ;;  %v155_v7 = vmul.f32 %v1489_v3, %v1496_v5  ;;  %v156_v16 = vmul.f32 %v1489_v3, %v1513_v11  ;;  %v1528_v20 = vld [vmem:[%s2089_s24 + $0x18] sm:$0xff]  ;;  %v1553_v31 = vld [vmem:[%s2090_s26 + $0x8] sm:$0xff]  ;;  %v148_v32 = vld [vmem:[%s2089_s24 + $0x20] sm:$0xff] }
  0x1c   :  { %v207_v9 = vsel %vm163_vm0, %v199_v4, 0.0  ;;  %v210_v17 = vsel %vm163_vm0, %v200_v14, 0.0  ;;  %v213_v18 = vsel %vm163_vm0, %v201_v15, 0.0  ;;  %v1536_v22 = vld [vmem:[%s2088_s1 + $0x18] sm:$0xff]  ;;  %v158_v24 = vmul.f32 %v1489_v3, %v1528_v20  ;;  %v1561_v33 = vld [vmem:[%s2090_s26] sm:$0xff]  ;;  %v241_v40 = vld [vmem:[%s2090_s26 + $0x10] sm:$0xff] }
  0x1d   :  { %208 = vadd.xlane.f32.xlu1 %v207_v9  ;;  %v170_v12 = vsel %vm163_vm0, %v157_v6, 0.0  ;;  %v164_v13 = vsel %vm163_vm0, %v155_v7, 0.0  ;;  %v167_v19 = vsel %vm163_vm0, %v156_v16, 0.0  ;;  %v202_v25 = vmul.f32 %v1481_v1, %v1536_v22  ;;  %v1577_v41 = vld [vmem:[%s2089_s24 + $0x28] sm:$0xff]  ;;  %v192_v42 = vld [vmem:[%s2088_s1 + $0x20] sm:$0xff]  ;;  %v1592_v49 = vld [vmem:[%s2090_s26 + $0x18] sm:$0xff] }
  0x1e   :  { %171 = vadd.xlane.f32.xlu2 %v170_v12  ;;  %165 = vadd.xlane.f32.xlu0 %v164_v13  ;;  %v173_v27 = vsel %vm163_vm0, %v158_v24, 0.0  ;;  %v251_v34 = vmul.f32 %v1546_v28, %v1553_v31  ;;  %v159_v35 = vmul.f32 %v1489_v3, %v148_v32  ;;  %v250_v36 = vmul.f32 %v1546_v28, %v1561_v33  ;;  %v150_v50 = vld [vmem:[%s2089_s24 + $0x30] sm:$0xff]  ;;  %v1600_v51 = vld [vmem:[%s2088_s1 + $0x28] sm:$0xff]  ;;  %v243_v58 = vld [vmem:[%s2090_s26 + $0x20] sm:$0xff] }
  0x1f   :  { %v216_v29 = vsel %vm163_vm0, %v202_v25, 0.0  ;;  %v252_v43 = vmul.f32 %v1546_v28, %v241_v40  ;;  %v160_v44 = vmul.f32 %v1489_v3, %v1577_v41  ;;  %v203_v45 = vmul.f32 %v1481_v1, %v192_v42  ;;  %v151_v59 = vld [vmem:[%s2089_s24 + $0x38] sm:$0xff]  ;;  %v194_v60 = vld [vmem:[%s2088_s1 + $0x30] sm:$0xff]  ;;  %v1628_v7 = vld [vmem:[%s2090_s26 + $0x28] sm:$0xff] }
  0x20   :  { %v261_v37 = vsel %vm163_vm0, %v251_v34, 0.0  ;;  %v176_v38 = vsel %vm163_vm0, %v159_v35, 0.0  ;;  %v258_v39 = vsel %vm163_vm0, %v250_v36, 0.0  ;;  %v253_v52 = vmul.f32 %v1546_v28, %v1592_v49  ;;  %v245_v9 = vld [vmem:[%s2090_s26 + $0x30] sm:$0xff]  ;;  %v108_v34 = vld [vmem:[%s2064_s4 + $0x8] sm:$0xff]  ;;  %v107_v36 = vld [vmem:[%s2064_s4] sm:$0xff] }
  0x21   :  { %v264_v46 = vsel %vm163_vm0, %v252_v43, 0.0  ;;  %v179_v47 = vsel %vm163_vm0, %v160_v44, 0.0  ;;  %v219_v48 = vsel %vm163_vm0, %v203_v45, 0.0  ;;  %v161_v53 = vmul.f32 %v1489_v3, %v150_v50 }
  0x22   :  { %v204_v54 = vmul.f32 %v1481_v1, %v1600_v51  ;;  %v267_v55 = vsel %vm163_vm0, %v253_v52, 0.0  ;;  %v254_v61 = vmul.f32 %v1546_v28, %v243_v58  ;;  %v162_v62 = vmul.f32 %v1489_v3, %v151_v59  ;;  %v1636_v3 = vld [vmem:[%s2088_s1 + $0x38] sm:$0xff] }
  0x23   :  { %v182_v56 = vsel %vm163_vm0, %v161_v53, 0.0  ;;  %v205_v63 = vmul.f32 %v1481_v1, %v194_v60  ;;  %v255_v10 = vmul.f32 %v1546_v28, %v1628_v7  ;;  %v256_v12 = vmul.f32 %v1546_v28, %v245_v9 }
  0x24   :  { %v222_v57 = vsel %vm163_vm0, %v204_v54, 0.0  ;;  %v270_v2 = vsel %vm163_vm0, %v254_v61, 0.0  ;;  %v185_v4 = vsel %vm163_vm0, %v162_v62, 0.0  ;;  %v206_v13 = vmul.f32 %v1481_v1, %v1636_v3  ;;  %v109_v54 = vld [vmem:[%s2064_s4 + $0x10] sm:$0xff] }
  0x25   :  { %211 = vadd.xlane.f32.xlu1 %v210_v17  ;;  %v225_v6 = vsel %vm163_vm0, %v205_v63, 0.0  ;;  %v273_v14 = vsel %vm163_vm0, %v255_v10, 0.0  ;;  %v276_v15 = vsel %vm163_vm0, %v256_v12, 0.0  ;;  %v246_v17 = vld [vmem:[%s2090_s26 + $0x38] sm:$0xff]  ;;  %vm299_vm2 = vcmp.gt.f32.partialorder %v108_v34, 0.5 }
  0x26   :  { %214 = vadd.xlane.f32.xlu2 %v213_v18  ;;  %168 = vadd.xlane.f32.xlu0 %v167_v19  ;;  %v228_v16 = vsel %vm163_vm0, %v206_v13, 0.0  ;;  %v257_v18 = vmul.f32 %v1546_v28, %v246_v17  ;;  %vm298_vm4 = vcmp.gt.f32.partialorder %v107_v36, 0.5  ;;  %vm300_vm5 = vcmp.gt.f32.partialorder %v109_v54, 0.5 }
  0x28   :  { %v279_v19 = vsel %vm163_vm0, %v257_v18, 0.0 }
  0x2d   :  { %174 = vadd.xlane.f32.xlu1 %v173_v27 }
  0x2e   :  { %217 = vadd.xlane.f32.xlu2 %v216_v29  ;;  %125 = vadd.xlane.f32.xlu0 %v124_v30 }
  0x35   :  { %262 = vadd.xlane.f32.xlu1 %v261_v37 }
  0x36   :  { %177 = vadd.xlane.f32.xlu2 %v176_v38  ;;  %259 = vadd.xlane.f32.xlu0 %v258_v39 }
  0x3d   :  { %265 = vadd.xlane.f32.xlu1 %v264_v46 }
  0x3e   :  { %180 = vadd.xlane.f32.xlu2 %v179_v47  ;;  %220 = vadd.xlane.f32.xlu0 %v219_v48 }
  0x45   :  { %268 = vadd.xlane.f32.xlu1 %v267_v55 }
  0x46   :  { %183 = vadd.xlane.f32.xlu2 %v182_v56  ;;  %223 = vadd.xlane.f32.xlu0 %v222_v57 }
  0x4d   :  { %271 = vadd.xlane.f32.xlu1 %v270_v2 }
  0x4e   :  { %186 = vadd.xlane.f32.xlu2 %v185_v4  ;;  %226 = vadd.xlane.f32.xlu0 %v225_v6 }
  0x55   :  { %274 = vadd.xlane.f32.xlu1 %v273_v14 }
  0x56   :  { %277 = vadd.xlane.f32.xlu2 %v276_v15  ;;  %229 = vadd.xlane.f32.xlu0 %v228_v16  ;;  %v110_v16 = vld [vmem:[%s2064_s4 + $0x18] sm:$0xff] }
  0x57   :  { %vm301_vm6 = vcmp.gt.f32.partialorder %v110_v16, 0.5 }
  0x5e   :  { %280 = vadd.xlane.f32.xlu0 %v279_v19 }
  0x90   :  { %v209_v21 = vpop.xlane.xlu1 %208 }
  0x91   :  { %v172_v1 = vpop.xlane.xlu2 %171  ;;  %v166_v23 = vpop.xlane.xlu0 %165 }
  0x92   :  { %v231_v35 = vadd.f32 %v209_v21, %v166_v23 }
  0x98   :  { %v212_v24 = vpop.xlane.xlu1 %211 }
  0x99   :  { %v215_v25 = vpop.xlane.xlu2 %214  ;;  %v169_v26 = vpop.xlane.xlu0 %168 }
  0x9a   :  { %v232_v32 = vadd.f32 %v212_v24, %v169_v26  ;;  %v233_v50 = vadd.f32 %v215_v25, %v172_v1 }
  0xa0   :  { %v175_v27 = vpop.xlane.xlu1 %174 }
  0xa1   :  { %v218_v29 = vpop.xlane.xlu2 %217  ;;  %v1651_v30 = vpop.xlane.xlu0 %125 }
  0xa2   :  { %v129_v37 = vperm.slane %v1651_v30, 1  ;;  %v128_v42 = vperm.slane %v1651_v30, 0  ;;  %v130_v58 = vperm.slane %v1651_v30, 2  ;;  %v234_v13 = vadd.f32 %v218_v29, %v175_v27 }
  0xa3   :  { %v131_v1 = vperm.slane %v1651_v30, 3 }
  0xa8   :  { %v263_v28 = vpop.xlane.xlu1 %262 }
  0xa9   :  { %v283_v38 = vadd.f32 %v263_v28, %v232_v32  ;;  %v178_v39 = vpop.xlane.xlu2 %177  ;;  %v260_v40 = vpop.xlane.xlu0 %259 }
  0xaa   :  { %v282_v43 = vadd.f32 %v260_v40, %v231_v35 }
  0xab   :  { %v291_v44 = vadd.f32 %v283_v38, %v129_v37 }
  0xac   :  { %v290_v45 = vadd.f32 %v282_v43, %v128_v42 }
  0xad   :  { %v307_v46 = vsel %vm299_vm2, -1e+10, %v291_v44  ;;  %v111_v44 = vld [vmem:[%s2064_s4 + $0x20] sm:$0xff] }
  0xae   :  { %v322_v47 = vsel %vm314_vm3, %v307_v46, -inf  ;;  %v306_v48 = vsel %vm298_vm4, -1e+10, %v290_v45  ;;  %vm302_vm7 = vcmp.gt.f32.partialorder %v111_v44, 0.5 }
  0xaf   :  { %v323_v52 = vrot.slane %v322_v47, 4  ;;  %v315_v53 = vsel %vm314_vm3, %v306_v48, -inf }
  0xb0   :  { %v316_v55 = vrot.slane %v315_v53, 4  ;;  %v266_v56 = vpop.xlane.xlu1 %265 }
  0xb1   :  { %v324_v57 = vmax.f32 %v322_v47, %v323_v52  ;;  %v284_v59 = vadd.f32 %v266_v56, %v233_v50  ;;  %v181_v60 = vpop.xlane.xlu2 %180  ;;  %v221_v61 = vpop.xlane.xlu0 %220 }
  0xb2   :  { %v317_v62 = vmax.f32 %v315_v53, %v316_v55  ;;  %v235_v42 = vadd.f32 %v221_v61, %v178_v39 }
  0xb3   :  { %v325_v63 = vrot.slane %v324_v57, 2  ;;  %v292_v2 = vadd.f32 %v284_v59, %v130_v58 }
  0xb4   :  { %v318_v4 = vrot.slane %v317_v62, 2 }
  0xb5   :  { %v326_v6 = vmax.f32 %v324_v57, %v325_v63  ;;  %v308_v9 = vsel %vm300_vm5, -1e+10, %v292_v2 }
  0xb6   :  { %v319_v10 = vmax.f32 %v317_v62, %v318_v4  ;;  %v329_v12 = vsel %vm314_vm3, %v308_v9, -inf  ;;  %v133_v4 = vperm.slane %v1651_v30, 5 }
  0xb7   :  { %v327_v14 = vrot.slane %v326_v6, 1  ;;  %v330_v15 = vrot.slane %v329_v12, 4 }
  0xb8   :  { %v320_v17 = vrot.slane %v319_v10, 1  ;;  %v269_v18 = vpop.xlane.xlu1 %268 }
  0xb9   :  { %v328_v19 = vmax.f32 %v326_v6, %v327_v14  ;;  %v331_v21 = vmax.f32 %v329_v12, %v330_v15  ;;  %v285_v23 = vadd.f32 %v269_v18, %v234_v13  ;;  %v184_v24 = vpop.xlane.xlu2 %183  ;;  %v224_v25 = vpop.xlane.xlu0 %223  ;;  %v112_v12 = vld [vmem:[%s2064_s4 + $0x28] sm:$0xff] }
  0xba   :  { %v321_v26 = vmax.f32 %v319_v10, %v320_v17  ;;  %v236_v63 = vadd.f32 %v224_v25, %v181_v60  ;;  %vm303_vm8 = vcmp.gt.f32.partialorder %v112_v12, 0.5 }
  0xbb   :  { %v372_v32 = vsub.f32 %v307_v46, %v328_v19  ;;  %v332_v34 = vrot.slane %v331_v21, 2  ;;  %v293_v27 = vadd.f32 %v285_v23, %v131_v1  ;;  %v1361_v23 = vmov 0  }
  0xbc   :  { %v371_v29 = vsub.f32 %v306_v48, %v321_v26  ;;  %v132_v48 = vperm.slane %v1651_v30, 4  ;;  %1198 = vset.pattern.permute.xlu2 %v1361_v23  ;;  %1197 = vset.pattern.permute.xlu1 %v1361_v23 }
  0xbd   :  { %v381_v35 = vmul.f32 1.442695, %v372_v32  ;;  %v333_v28 = vmax.f32 %v331_v21, %v332_v34  ;;  %v309_v36 = vsel %vm301_vm6, -1e+10, %v293_v27  ;;  %v134_v21 = vperm.slane %v1651_v30, 6  ;;  %v113_v32 = vld [vmem:[%s2064_s4 + $0x30] sm:$0xff]  ;;  %1199 = vset.pattern.permute.xlu0 %v1361_v23 }
  0xbe   :  { %v379_v37 = vmul.f32 1.442695, %v371_v29  ;;  %v336_v38 = vsel %vm314_vm3, %v309_v36, -inf  ;;  %vm304_vm9 = vcmp.gt.f32.partialorder %v113_v32, 0.5 }
  0xbf   :  { %1206 = vpow2.f32 %v381_v35  ;;  %v334_v40 = vrot.slane %v333_v28, 1  ;;  %v337_v43 = vrot.slane %v336_v38, 4 }
  0xc0   :  { %1208 = vpow2.f32 %v379_v37  ;;  %v272_v45 = vpop.xlane.xlu1 %271 }
  0xc1   :  { %v335_v46 = vmax.f32 %v333_v28, %v334_v40  ;;  %v338_v47 = vmax.f32 %v336_v38, %v337_v43  ;;  %v286_v50 = vadd.f32 %v272_v45, %v235_v42  ;;  %v187_v52 = vpop.xlane.xlu2 %186  ;;  %v227_v53 = vpop.xlane.xlu0 %226  ;;  %v135_v38 = vperm.slane %v1651_v30, 7 }
  0xc2   :  { %v237_v15 = vadd.f32 %v227_v53, %v184_v24 }
  0xc3   :  { %v373_v54 = vsub.f32 %v308_v9, %v335_v46  ;;  %v339_v55 = vrot.slane %v338_v47, 2  ;;  %v294_v56 = vadd.f32 %v286_v50, %v132_v48 }
  0xc5   :  { %v1677_v57 = vpop.eup %1206  ;;  %v383_v39 = vmul.f32 1.442695, %v373_v54  ;;  %v340_v58 = vmax.f32 %v338_v47, %v339_v55  ;;  %v1679_v59 = vsel %vm302_vm7, -1e+10, %v294_v56 }
  0xc6   :  { %v1681_v61 = vpop.eup %1208  ;;  %v402_v62 = vsel %vm314_vm3, %v1677_v57, 0.0  ;;  %v343_v2 = vsel %vm314_vm3, %v1679_v59, -inf }
  0xc7   :  { %v403_v6 = vrot.slane %v402_v62, 4  ;;  %v395_v9 = vsel %vm314_vm3, %v1681_v61, 0.0  ;;  %1210 = vpow2.f32 %v383_v39  ;;  %v341_v10 = vrot.slane %v340_v58, 1  ;;  %v114_v39 = vld [vmem:[%s2064_s4 + $0x38] sm:$0xff]  ;;  %s1144_s4 = sshll.u32 %s2078_s18, 4  ;;  %s1145_s4 = int_to_ptr.hbm [resolvable:$true] %s1144_s4 }
  0xc8   :  { %v396_v13 = vrot.slane %v395_v9, 4  ;;  %v344_v14 = vrot.slane %v343_v2, 4  ;;  %v275_v16 = vpop.xlane.xlu1 %274  ;;  %vm305_vm10 = vcmp.gt.f32.partialorder %v114_v39, 0.5 }
  0xc9   :  { %v404_v60 = vadd.f32 %v403_v6, %v402_v62  ;;  %v342_v17 = vmax.f32 %v340_v58, %v341_v10  ;;  %v287_v18 = vadd.f32 %v275_v16, %v236_v63  ;;  %v278_v19 = vpop.xlane.xlu2 %277  ;;  %v230_v1 = vpop.xlane.xlu0 %229 }
  0xca   :  { %v397_v25 = vadd.f32 %v396_v13, %v395_v9  ;;  %v345_v26 = vmax.f32 %v343_v2, %v344_v14  ;;  %v288_v34 = vadd.f32 %v278_v19, %v237_v15  ;;  %v238_v56 = vadd.f32 %v230_v1, %v187_v52 }
  0xcb   :  { %v405_v24 = vrot.slane %v404_v60, 2  ;;  %v374_v27 = vsub.f32 %v309_v36, %v342_v17  ;;  %v295_v29 = vadd.f32 %v287_v18, %v133_v4 }
  0xcc   :  { %v398_v35 = vrot.slane %v397_v25, 2  ;;  %v346_v28 = vrot.slane %v345_v26, 2  ;;  %v296_v37 = vadd.f32 %v288_v34, %v134_v21 }
  0xcd   :  { %v1698_v40 = vpop.eup %1210  ;;  %v406_v42 = vadd.f32 %v405_v24, %v404_v60  ;;  %v385_v43 = vmul.f32 1.442695, %v374_v27  ;;  %v1700_v44 = vsel %vm303_vm8, -1e+10, %v295_v29 }
  0xce   :  { %v399_v45 = vadd.f32 %v398_v35, %v397_v25  ;;  %v409_v46 = vsel %vm314_vm3, %v1698_v40, 0.0  ;;  %v347_v47 = vmax.f32 %v345_v26, %v346_v28  ;;  %v350_v36 = vsel %vm314_vm3, %v1700_v44, -inf }
  0xcf   :  { %v407_v48 = vrot.slane %v406_v42, 1  ;;  %v410_v50 = vrot.slane %v409_v46, 4  ;;  %1212 = vpow2.f32 %v385_v43  ;;  %v351_v53 = vrot.slane %v350_v36, 4 }
  0xd0   :  { %v400_v30 = vrot.slane %v399_v45, 1  ;;  %v348_v54 = vrot.slane %v347_v47, 1  ;;  %v1706_v55 = vsel %vm304_vm9, -1e+10, %v296_v37 }
  0xd1   :  { %v1711_v58 = vadd.f32 %v407_v48, %v406_v42  ;;  %v411_v62 = vadd.f32 %v410_v50, %v409_v46  ;;  %v352_v63 = vmax.f32 %v350_v36, %v351_v53  ;;  %v357_v2 = vsel %vm314_vm3, %v1706_v55, -inf  ;;  %v281_v4 = vpop.xlane.xlu0 %280 }
  0xd2   :  { %v1715_v6 = vadd.f32 %v400_v30, %v399_v45  ;;  %v349_v9 = vmax.f32 %v347_v47, %v348_v54  ;;  %v358_v10 = vrot.slane %v357_v2, 4  ;;  %v289_v12 = vadd.f32 %v281_v4, %v238_v56 }
  0xd3   :  { %1214 = vrcp.f32 %v1711_v58  ;;  %v412_v52 = vrot.slane %v411_v62, 2  ;;  %v353_v13 = vrot.slane %v352_v63, 2  ;;  %v475_v19 = vand.u32 2147483647, %v1711_v58 }
  0xd4   :  { %1216 = vrcp.f32 %v1715_v6  ;;  %v375_v14 = vsub.f32 %v1679_v59, %v349_v9  ;;  %v359_v15 = vmax.f32 %v357_v2, %v358_v10  ;;  %v297_v16 = vadd.f32 %v289_v12, %v135_v38 }
  0xd5   :  { %v1720_v60 = vpop.eup %1212  ;;  %v413_v17 = vadd.f32 %v412_v52, %v411_v62  ;;  %v354_v18 = vmax.f32 %v352_v63, %v353_v13  ;;  %v477_v21 = vand.u32 2147483648, %v1711_v58  ;;  %vm471_vm11 = vweird.f32 %v1711_v58 }
  0xd6   :  { %v416_v1 = vsel %vm314_vm3, %v1720_v60, 0.0  ;;  %v387_v23 = vmul.f32 1.442695, %v375_v14  ;;  %v360_v25 = vrot.slane %v359_v15, 2  ;;  %v1726_v26 = vsel %vm305_vm10, -1e+10, %v297_v16 }
  0xd7   :  { %v414_v32 = vrot.slane %v413_v17, 1  ;;  %v417_v34 = vrot.slane %v416_v1, 4  ;;  %v355_v59 = vrot.slane %v354_v18, 1  ;;  %v364_v24 = vsel %vm314_vm3, %v1726_v26, -inf }
  0xd8   :  { %1218 = vpow2.f32 %v387_v23  ;;  %v361_v27 = vmax.f32 %v359_v15, %v360_v25  ;;  %v365_v29 = vrot.slane %v364_v24, 4  ;;  %v478_v42 = vor.u32 1.1754944e-38, %v477_v21 }
  0xd9   :  { %v1215_v35 = vpop.eup %1214  ;;  %v1731_v28 = vadd.f32 %v414_v32, %v413_v17  ;;  %v418_v37 = vadd.f32 %v417_v34, %v416_v1  ;;  %v356_v38 = vmax.f32 %v354_v18, %v355_v59  ;;  %vm1734_vm13 = vcmp.eq.f32.partialorder %v475_v19, 8.507059e+37 }
  0xda   :  { %v1217_v43 = vpop.eup %1216  ;;  %v362_v45 = vrot.slane %v361_v27, 1  ;;  %v366_v46 = vmax.f32 %v364_v24, %v365_v29  ;;  %v467_v47 = vmul.f32 %v1215_v35, %v1711_v58  ;;  %vm472_vm12 = vweird.f32 %v1215_v35 }
  0xdb   :  { %1220 = vrcp.f32 %v1731_v28  ;;  %v419_v48 = vrot.slane %v418_v37, 2  ;;  %v376_v50 = vsub.f32 %v1700_v44, %v356_v38  ;;  %v452_v53 = vmul.f32 %v1217_v43, %v1715_v6  ;;  %vm473_vm2 = vmor %vm471_vm11, %vm472_vm12 }
  0xdc   :  { %v363_v30 = vmax.f32 %v361_v27, %v362_v45  ;;  %v367_v54 = vrot.slane %v366_v46, 2  ;;  %v468_v56 = vsub.f32 1.0, %v467_v47  ;;  %vm456_vm14 = vweird.f32 %v1715_v6 }
  0xdd   :  { %v420_v39 = vadd.f32 %v419_v48, %v418_v37  ;;  %v389_v62 = vmul.f32 1.442695, %v376_v50  ;;  %v453_v63 = vsub.f32 1.0, %v452_v53  ;;  %vm457_vm15 = vweird.f32 %v1217_v43 }
  0xde   :  { %v1742_v2 = vpop.eup %1218  ;;  %v377_v4 = vsub.f32 %v1706_v55, %v363_v30  ;;  %v368_v9 = vmax.f32 %v366_v46, %v367_v54  ;;  %v469_v10 = vmul.f32 %v1215_v35, %v468_v56  ;;  %v460_v12 = vand.u32 2147483647, %v1715_v6  ;;  %vm458_vm5 = vmor %vm456_vm14, %vm457_vm15 }
  0xdf   :  { %v421_v44 = vrot.slane %v420_v39, 1  ;;  %v423_v52 = vsel %vm314_vm3, %v1742_v2, 0.0  ;;  %1222 = vpow2.f32 %v389_v62  ;;  %v454_v13 = vmul.f32 %v1217_v43, %v453_v63 }
  0xe0   :  { %v424_v14 = vrot.slane %v423_v52, 4  ;;  %v391_v15 = vmul.f32 1.442695, %v377_v4  ;;  %v369_v16 = vrot.slane %v368_v9, 1  ;;  %v470_v17 = vadd.f32 %v1215_v35, %v469_v10 }
  0xe1   :  { %v1221_v18 = vpop.eup %1220  ;;  %v1748_v19 = vadd.f32 %v421_v44, %v420_v39  ;;  %v455_v55 = vadd.f32 %v1217_v43, %v454_v13  ;;  %vm1753_vm4 = vcmp.eq.f32.partialorder %v460_v12, 8.507059e+37  ;;  %v462_v1 = vand.u32 2147483648, %v1715_v6 }
  0xe2   :  { %v425_v23 = vadd.f32 %v424_v14, %v423_v52  ;;  %1224 = vpow2.f32 %v391_v15  ;;  %v370_v25 = vmax.f32 %v368_v9, %v369_v16  ;;  %v474_v32 = vsel %vm473_vm2, %v1215_v35, %v470_v17 }
  0xe3   :  { %1226 = vrcp.f32 %v1748_v19  ;;  %v479_v58 = vsel %vm1734_vm13, %v478_v42, %v474_v32  ;;  %v459_v34 = vsel %vm458_vm5, %v1217_v43, %v455_v55  ;;  %v463_v59 = vor.u32 1.1754944e-38, %v462_v1 }
  0xe4   :  { %v426_v24 = vrot.slane %v425_v23, 2  ;;  %v378_v27 = vsub.f32 %v1726_v26, %v370_v25  ;;  %v480_v29 = vmul.f32 %v1677_v57, %v479_v58  ;;  %v482_v37 = vmul.f32 %v1221_v18, %v1731_v28 }
  0xe5   :  { %v1767_v38 = vpop.eup %1222  ;;  %v464_v6 = vsel %vm1753_vm4, %v463_v59, %v459_v34  ;;  %v490_v43 = vand.u32 2147483647, %v1731_v28  ;;  %v492_v48 = vand.u32 2147483648, %v1731_v28  ;;  %vm487_vm6 = vweird.f32 %v1221_v18 }
  0xe6   :  { %v427_v35 = vadd.f32 %v426_v24, %v425_v23  ;;  %v430_v45 = vsel %vm314_vm3, %v1767_v38, 0.0  ;;  %v393_v46 = vmul.f32 1.442695, %v378_v27  ;;  %578 = vperm.xlu2 %1198, %v480_v29   ;;  %1130 = vst.msk [vmem:[%s2079_s19 + $0x8] sm:$0xff] %vm314_vm3, %v480_v29  ;;  %v465_v57 = vmul.f32 %v1681_v61, %v464_v6 }
  0xe7   :  { %v431_v26 = vrot.slane %v430_v45, 4  ;;  %v483_v42 = vsub.f32 1.0, %v482_v37  ;;  %vm486_vm7 = vweird.f32 %v1731_v28  ;;  %vm491_vm8 = vcmp.eq.f32.partialorder %v490_v43, 8.507059e+37 }
  0xe8   :  { %v1779_v47 = vpop.eup %1224  ;;  %v428_v36 = vrot.slane %v427_v35, 1  ;;  %1228 = vpow2.f32 %v393_v46  ;;  %573 = vperm.xlu1 %1197, %v465_v57   ;;  %1129 = vst.msk [vmem:[%s2079_s19] sm:$0xff] %vm314_vm3, %v465_v57  ;;  %vm488_vm9 = vmor %vm486_vm7, %vm487_vm6  ;;  %v493_v9 = vor.u32 1.1754944e-38, %v492_v48  ;;  %v505_v52 = vand.u32 2147483647, %v1748_v19 }
  0xe9   :  { %v1227_v50 = vpop.eup %1226  ;;  %v432_v53 = vadd.f32 %v431_v26, %v430_v45  ;;  %v437_v61 = vsel %vm314_vm3, %v1779_v47, 0.0  ;;  %v484_v30 = vmul.f32 %v1221_v18, %v483_v42  ;;  %v507_v13 = vand.u32 2147483648, %v1748_v19 }
  0xea   :  { %v1788_v54 = vadd.f32 %v428_v36, %v427_v35  ;;  %v438_v56 = vrot.slane %v437_v61, 4  ;;  %v497_v39 = vmul.f32 %v1227_v50, %v1748_v19  ;;  %vm502_vm10 = vweird.f32 %v1227_v50 }
  0xeb   :  { %v433_v62 = vrot.slane %v432_v53, 2  ;;  %v485_v63 = vadd.f32 %v1221_v18, %v484_v30  ;;  %vm501_vm11 = vweird.f32 %v1748_v19  ;;  %v508_v32 = vor.u32 1.1754944e-38, %v507_v13 }
  0xec   :  { %1230 = vrcp.f32 %v1788_v54  ;;  %v439_v4 = vadd.f32 %v438_v56, %v437_v61  ;;  %v498_v10 = vsub.f32 1.0, %v497_v39  ;;  %vm503_vm12 = vmor %vm501_vm11, %vm502_vm10  ;;  %vm506_vm13 = vcmp.eq.f32.partialorder %v505_v52, 8.507059e+37 }
  0xed   :  { %v434_v12 = vadd.f32 %v433_v62, %v432_v53  ;;  %v489_v44 = vsel %vm488_vm9, %v1221_v18, %v485_v63  ;;  %v522_v45 = vand.u32 2147483648, %v1788_v54  ;;  %v520_v57 = vand.u32 2147483647, %v1788_v54 }
  0xee   :  { %v1795_v14 = vpop.eup %1228  ;;  %v440_v15 = vrot.slane %v439_v4, 2  ;;  %v494_v16 = vsel %vm491_vm8, %v493_v9, %v489_v44  ;;  %v499_v17 = vmul.f32 %v1227_v50, %v498_v10  ;;  %vm516_vm15 = vweird.f32 %v1788_v54 }
  0xef   :  { %v435_v28 = vrot.slane %v434_v12, 1  ;;  %v444_v55 = vsel %vm314_vm3, %v1795_v14, 0.0  ;;  %v495_v21 = vmul.f32 %v1698_v40, %v494_v16  ;;  %v523_v36 = vor.u32 1.1754944e-38, %v522_v45 }
  0xf0   :  { %v441_v1 = vadd.f32 %v440_v15, %v439_v4  ;;  %v445_v23 = vrot.slane %v444_v55, 4  ;;  %v500_v25 = vadd.f32 %v1227_v50, %v499_v17  ;;  %vm521_vm4 = vcmp.eq.f32.partialorder %v520_v57, 8.507059e+37 }
  0xf1   :  { %v436_v18 = vadd.f32 %v435_v28, %v434_v12  ;;  %583 = vperm.xlu0 %1199, %v495_v21   ;;  %1131 = vst.msk [vmem:[%s2079_s19 + $0x10] sm:$0xff] %vm314_vm3, %v495_v21 }
  0xf2   :  { %v1231_v58 = vpop.eup %1230  ;;  %v442_v34 = vrot.slane %v441_v1, 1  ;;  %v446_v59 = vadd.f32 %v445_v23, %v444_v55  ;;  %v504_v24 = vsel %vm503_vm12, %v1227_v50, %v500_v25 }
  0xf3   :  { %1232 = vrcp.f32 %v436_v18  ;;  %v509_v40 = vsel %vm506_vm13, %v508_v32, %v504_v24  ;;  %v512_v27 = vmul.f32 %v1231_v58, %v1788_v54  ;;  %vm517_vm14 = vweird.f32 %v1231_v58 }
  0xf4   :  { %v443_v29 = vadd.f32 %v442_v34, %v441_v1  ;;  %v447_v19 = vrot.slane %v446_v59, 2  ;;  %v510_v37 = vmul.f32 %v1720_v60, %v509_v40  ;;  %vm518_vm2 = vmor %vm516_vm15, %vm517_vm14  ;;  %v537_v39 = vand.u32 2147483648, %v436_v18 }
  0xf5   :  { %v513_v6 = vsub.f32 1.0, %v512_v27  ;;  %v535_v4 = vand.u32 2147483647, %v436_v18  ;;  %vm531_vm6 = vweird.f32 %v436_v18 }
  0xf6   :  { %1234 = vrcp.f32 %v443_v29  ;;  %v448_v35 = vadd.f32 %v447_v19, %v446_v59  ;;  %1132 = vst.msk [vmem:[%s2079_s19 + $0x18] sm:$0xff] %vm314_vm3, %v510_v37  ;;  %588 = vperm.xlu2 %1198, %v510_v37   ;;  %v552_v10 = vand.u32 2147483648, %v443_v29  ;;  %v538_v12 = vor.u32 1.1754944e-38, %v537_v39 }
  0xf7   :  { %v514_v46 = vmul.f32 %v1231_v58, %v513_v6  ;;  %vm536_vm9 = vcmp.eq.f32.partialorder %v535_v4, 8.507059e+37  ;;  %vm546_vm10 = vweird.f32 %v443_v29 }
  0xf8   :  { %v449_v26 = vrot.slane %v448_v35, 1  ;;  %v553_v55 = vor.u32 1.1754944e-38, %v552_v10 }
  0xf9   :  { %v1233_v42 = vpop.eup %1232  ;;  %v515_v43 = vadd.f32 %v1231_v58, %v514_v46 }
  0xfa   :  { %v450_v60 = vadd.f32 %v449_v26, %v448_v35  ;;  %v527_v48 = vmul.f32 %v1233_v42, %v436_v18  ;;  %vm532_vm5 = vweird.f32 %v1233_v42 }
  0xfb   :  { %v519_v50 = vsel %vm518_vm2, %v1231_v58, %v515_v43  ;;  %vm533_vm7 = vmor %vm531_vm6, %vm532_vm5  ;;  %vm827_vm5 = vcmask 1043459   ;;  %vm829_vm6 = vcmask 1044484  }
  0xfc   :  { %v1235_v53 = vpop.eup %1234  ;;  %1236 = vrcp.f32 %v450_v60  ;;  %v524_v61 = vsel %vm521_vm4, %v523_v36, %v519_v50  ;;  %v528_v30 = vsub.f32 1.0, %v527_v48  ;;  %v567_v25 = vand.u32 2147483648, %v450_v60 }
  0xfd   :  { %v525_v56 = vmul.f32 %v1742_v2, %v524_v61  ;;  %v542_v62 = vmul.f32 %v1235_v53, %v443_v29  ;;  %vm547_vm8 = vweird.f32 %v1235_v53  ;;  %v550_v2 = vand.u32 2147483647, %v443_v29 }
  0xfe   :  { %v529_v63 = vmul.f32 %v1233_v42, %v528_v30  ;;  %vm548_vm11 = vmor %vm546_vm10, %vm547_vm8  ;;  %v565_v58 = vand.u32 2147483647, %v450_v60  ;;  %vm561_vm14 = vweird.f32 %v450_v60  ;;  %v568_v34 = vor.u32 1.1754944e-38, %v567_v25 }
  0xff   :  { %593 = vperm.xlu1 %1197, %v525_v56   ;;  %1133 = vst.msk [vmem:[%s2079_s19 + $0x20] sm:$0xff] %vm314_vm3, %v525_v56  ;;  %v543_v54 = vsub.f32 1.0, %v542_v62  ;;  %vm551_vm12 = vcmp.eq.f32.partialorder %v550_v2, 8.507059e+37  ;;  %vm825_vm4 = vcmask 1042434   ;;  %vm833_vm8 = vcmask 1046534  }
 0x100   :  { %v530_v9 = vadd.f32 %v1233_v42, %v529_v63  ;;  %vm566_vm2 = vcmp.eq.f32.partialorder %v565_v58, 8.507059e+37 }
 0x101   :  { %v544_v44 = vmul.f32 %v1235_v53, %v543_v54 }
 0x102   :  { %v1237_v52 = vpop.eup %1236  ;;  %v534_v13 = vsel %vm533_vm7, %v1233_v42, %v530_v9  ;;  %vm831_vm7 = vcmask 1045509  }
 0x103   :  { %v539_v15 = vsel %vm536_vm9, %v538_v12, %v534_v13  ;;  %v545_v16 = vadd.f32 %v1235_v53, %v544_v44  ;;  %v557_v17 = vmul.f32 %v1237_v52, %v450_v60  ;;  %vm562_vm13 = vweird.f32 %v1237_v52 }
 0x104   :  { %v540_v28 = vmul.f32 %v1767_v38, %v539_v15  ;;  %vm563_vm15 = vmor %vm561_vm14, %vm562_vm13  ;;  %vm835_vm9 = vcmask 1047559  }
 0x105   :  { %v549_v21 = vsel %vm548_vm11, %v1235_v53, %v545_v16  ;;  %v558_v1 = vsub.f32 1.0, %v557_v17  ;;  %v814_v17 = vld [vmem:[%s2071_s11 + $0x28] sm:$0xff] }
 0x106   :  { %598 = vperm.xlu2 %1198, %v540_v28   ;;  %1134 = vst.msk [vmem:[%s2079_s19 + $0x28] sm:$0xff] %vm314_vm3, %v540_v28  ;;  %v554_v23 = vsel %vm551_vm12, %v553_v55, %v549_v21  ;;  %v808_v28 = vld [vmem:[%s2070_s10 + $0x28] sm:$0xff]  ;;  %1159 = vmatpush.xpose.msk.msra.mxu0 %vm163_vm0, %v814_v17  ;;  %v934_v17 = vld [vmem:[%s2072_s12 + $0x10] sm:$0xff] }
 0x107   :  { %v555_v18 = vmul.f32 %v1779_v47, %v554_v23  ;;  %v559_v32 = vmul.f32 %v1237_v52, %v558_v1  ;;  %v937_v55 = vld [vmem:[%s2072_s12 + $0x28] sm:$0xff]  ;;  %1166 = vmatpush.xpose.msk.msra.mxu1 %vm163_vm0, %v808_v28 }
 0x108   :  { %1173 = vmatpush.xpose.msk.msra.mxu2 %vm163_vm0, %v937_v55 }
 0x109   :  { %603 = vperm.xlu1 %1197, %v555_v18   ;;  %1135 = vst.msk [vmem:[%s2079_s19 + $0x30] sm:$0xff] %vm314_vm3, %v555_v18  ;;  %v560_v38 = vadd.f32 %v1237_v52, %v559_v32 }
 0x10b   :  { %v564_v59 = vsel %vm563_vm15, %v1237_v52, %v560_v38 }
 0x10c   :  { %v569_v24 = vsel %vm566_vm2, %v568_v34, %v564_v59  ;;  %v813_v34 = vld [vmem:[%s2071_s11 + $0x20] sm:$0xff] }
 0x10d   :  { %v570_v40 = vmul.f32 %v1795_v14, %v569_v24  ;;  %1160 = vmatpush.xpose.msk.msra.mxu0 %vm163_vm0, %v813_v34 }
 0x10f   :  { %608 = vperm.xlu2 %1198, %v570_v40   ;;  %1136 = vst.msk [vmem:[%s2079_s19 + $0x38] sm:$0xff] %vm314_vm3, %v570_v40  ;;  %vm823_vm3 = vcmask 1041409  }
 0x140   :  { %v579_v47 = vpop.permute.xlu2 %578 }
 0x141   :  { %v612_v27 = vmul.f32 %v579_v47, %v1513_v11  ;;  %v676_v29 = vmul.f32 %v579_v47, %v1504_v8  ;;  %v740_v19 = vmul.f32 %v579_v47, %v1553_v31  ;;  %v807_v47 = vld [vmem:[%s2070_s10 + $0x20] sm:$0xff] }
 0x142   :  { %1167 = vmatpush.xpose.msk.msra.mxu1 %vm163_vm0, %v807_v47 }
 0x143   :  { %v626_v37 = vsel %vm163_vm0, %v612_v27, 0.0  ;;  %v690_v35 = vsel %vm163_vm0, %v676_v29, 0.0  ;;  %v754_v14 = vsel %vm163_vm0, %v740_v19, 0.0 }
 0x144   :  { %v627_v46 = vrot.slane %v626_v37, 4  ;;  %v691_v42 = vrot.slane %v690_v35, 4  ;;  %v755_v11 = vrot.slane %v754_v14, 4 }
 0x146   :  { %v628_v43 = vadd.f32 %v627_v46, %v626_v37  ;;  %v692_v36 = vadd.f32 %v691_v42, %v690_v35  ;;  %v756_v48 = vadd.f32 %v755_v11, %v754_v14  ;;  %v1242_v14 = vld [vmem:[%s2089_s24 + $0x10] sm:$0xff] }
 0x147   :  { %v1243_v42 = vld [vmem:[%s2088_s1 + $0x10] sm:$0xff] }
 0x148   :  { %v629_v30 = vrot.slane %v628_v43, 2  ;;  %v693_v39 = vrot.slane %v692_v36, 2  ;;  %v757_v62 = vrot.slane %v756_v48, 2 }
 0x14a   :  { %v630_v2 = vadd.f32 %v629_v30, %v628_v43  ;;  %v758_v15 = vadd.f32 %v757_v62, %v756_v48  ;;  %v806_v48 = vld [vmem:[%s2070_s10 + $0x18] sm:$0xff] }
 0x14b   :  { %v935_v30 = vld [vmem:[%s2072_s12 + $0x18] sm:$0xff]  ;;  %1168 = vmatpush.xpose.msk.msra.mxu1 %vm163_vm0, %v806_v48 }
 0x14c   :  { %v631_v27 = vrot.slane %v630_v2, 1  ;;  %v759_v46 = vrot.slane %v758_v15, 1 }
 0x14e   :  { %v1900_v62 = vadd.f32 %v759_v46, %v758_v15 }
 0x150   :  { %v589_v6 = vpop.permute.xlu2 %588 }
 0x151   :  { %v614_v45 = vmul.f32 %v589_v6, %v1528_v20  ;;  %v678_v57 = vmul.f32 %v589_v6, %v1536_v22  ;;  %v742_v26 = vmul.f32 %v589_v6, %v1592_v49 }
 0x153   :  { %v640_v8 = vsel %vm163_vm0, %v614_v45, 0.0  ;;  %v704_v31 = vsel %vm163_vm0, %v678_v57, 0.0  ;;  %v768_v60 = vsel %vm163_vm0, %v742_v26, 0.0 }
 0x154   :  { %v641_v50 = vrot.slane %v640_v8, 4  ;;  %v705_v53 = vrot.slane %v704_v31, 4  ;;  %v769_v61 = vrot.slane %v768_v60, 4 }
 0x156   :  { %v642_v63 = vadd.f32 %v641_v50, %v640_v8  ;;  %v706_v10 = vadd.f32 %v705_v53, %v704_v31  ;;  %v770_v12 = vadd.f32 %v769_v61, %v768_v60  ;;  %v812_v8 = vld [vmem:[%s2071_s11 + $0x18] sm:$0xff] }
 0x157   :  { %1161 = vmatpush.xpose.msk.msra.mxu0 %vm163_vm0, %v812_v8 }
 0x158   :  { %v707_v18 = vrot.slane %v706_v10, 2  ;;  %v771_v32 = vrot.slane %v770_v12, 2 }
 0x15a   :  { %v574_v20 = vpop.permute.xlu1 %573  ;;  %v708_v57 = vadd.f32 %v707_v18, %v706_v10  ;;  %v772_v43 = vadd.f32 %v771_v32, %v770_v12  ;;  %v811_v10 = vld [vmem:[%s2071_s11 + $0x10] sm:$0xff] }
 0x15b   :  { %v611_v22 = vmul.f32 %v574_v20, %v1496_v5  ;;  %v675_v49 = vmul.f32 %v574_v20, %v1476_v0  ;;  %v739_v56 = vmul.f32 %v574_v20, %v1561_v33  ;;  %v694_v5 = vadd.f32 %v693_v39, %v692_v36  ;;  %1162 = vmatpush.xpose.msk.msra.mxu0 %vm163_vm0, %v811_v10 }
 0x15c   :  { %v643_v0 = vrot.slane %v642_v63, 2  ;;  %v773_v12 = vrot.slane %v772_v43, 1 }
 0x15d   :  { %v619_v4 = vsel %vm163_vm0, %v611_v22, 0.0  ;;  %v683_v54 = vsel %vm163_vm0, %v675_v49, 0.0  ;;  %v747_v9 = vsel %vm163_vm0, %v739_v56, 0.0  ;;  %v695_v37 = vrot.slane %v694_v5, 1 }
 0x15e   :  { %v620_v44 = vrot.slane %v619_v4, 4  ;;  %v684_v52 = vrot.slane %v683_v54, 4  ;;  %v748_v13 = vrot.slane %v747_v9, 4  ;;  %v644_v29 = vadd.f32 %v643_v0, %v642_v63 }
 0x15f   :  { %v632_v22 = vadd.f32 %v631_v27, %v630_v2  ;;  %v696_v49 = vadd.f32 %v695_v37, %v694_v5  ;;  %v709_v63 = vrot.slane %v708_v57, 1  ;;  %v1930_v34 = vadd.f32 %v773_v12, %v772_v43 }
 0x160   :  { %v621_v16 = vadd.f32 %v620_v44, %v619_v4  ;;  %v599_v33 = vpop.permute.xlu2 %598  ;;  %v685_v21 = vadd.f32 %v684_v52, %v683_v54  ;;  %v749_v1 = vadd.f32 %v748_v13, %v747_v9  ;;  %v645_v50 = vrot.slane %v644_v29, 1  ;;  %v805_v13 = vld [vmem:[%s2070_s10 + $0x10] sm:$0xff] }
 0x161   :  { %v616_v23 = vmul.f32 %v599_v33, %v1577_v41  ;;  %v680_v25 = vmul.f32 %v599_v33, %v1600_v51  ;;  %v744_v38 = vmul.f32 %v599_v33, %v1628_v7  ;;  %v936_v7 = vld [vmem:[%s2072_s12 + $0x20] sm:$0xff]  ;;  %1169 = vmatpush.xpose.msk.msra.mxu1 %vm163_vm0, %v805_v13 }
 0x162   :  { %v622_v58 = vrot.slane %v621_v16, 2  ;;  %v686_v59 = vrot.slane %v685_v21, 2  ;;  %v750_v24 = vrot.slane %v749_v1, 2  ;;  %1174 = vmatpush.xpose.msk.msra.mxu2 %vm163_vm0, %v936_v7  ;;  %v1910_v5 = vadd.f32 %v645_v50, %v644_v29  ;;  %v1246_v7 = vld [vmem:[%s2090_s26 + $0x38] sm:$0xff]  ;;  %v933_v29 = vld [vmem:[%s2072_s12 + $0x8] sm:$0xff] }
 0x163   :  { %v654_v41 = vsel %vm163_vm0, %v616_v23, 0.0  ;;  %v718_v51 = vsel %vm163_vm0, %v680_v25, 0.0  ;;  %v584_v40 = vpop.permute.xlu0 %583  ;;  %v782_v35 = vsel %vm163_vm0, %v744_v38, 0.0  ;;  %v1923_v25 = vadd.f32 %v709_v63, %v708_v57  ;;  %v810_v38 = vld [vmem:[%s2071_s11 + $0x8] sm:$0xff] }
 0x164   :  { %v655_v19 = vrot.slane %v654_v41, 4  ;;  %v719_v6 = vrot.slane %v718_v51, 4  ;;  %v613_v45 = vmul.f32 %v1242_v14, %v584_v40  ;;  %v623_v26 = vadd.f32 %v622_v58, %v621_v16  ;;  %v1244_v16 = vld [vmem:[%s2090_s26 + $0x10] sm:$0xff]  ;;  %1163 = vmatpush.xpose.msk.msra.mxu0 %vm163_vm0, %v810_v38 }
 0x165   :  { %v677_v11 = vmul.f32 %v1243_v42, %v584_v40  ;;  %v687_v31 = vadd.f32 %v686_v59, %v685_v21  ;;  %v751_v60 = vadd.f32 %v750_v24, %v749_v1  ;;  %v783_v61 = vrot.slane %v782_v35, 4  ;;  %v1245_v21 = vld [vmem:[%s2089_s24 + $0x38] sm:$0xff] }
 0x166   :  { %v633_v36 = vsel %vm163_vm0, %v613_v45, 0.0  ;;  %v656_v53 = vadd.f32 %v655_v19, %v654_v41  ;;  %v720_v56 = vadd.f32 %v719_v6, %v718_v51  ;;  %v624_v4 = vrot.slane %v623_v26, 1  ;;  %1175 = vmatpush.xpose.msk.msra.mxu2 %vm163_vm0, %v935_v30 }
 0x167   :  { %v634_v20 = vrot.slane %v633_v36, 4  ;;  %v697_v39 = vsel %vm163_vm0, %v677_v11, 0.0  ;;  %v688_v44 = vrot.slane %v687_v31, 1  ;;  %v752_v2 = vrot.slane %v751_v60, 1  ;;  %v809_v11 = vld [vmem:[%s2071_s11] sm:$0xff] }
 0x168   :  { %v698_v52 = vrot.slane %v697_v39, 4  ;;  %v657_v15 = vrot.slane %v656_v53, 2  ;;  %v784_v0 = vadd.f32 %v783_v61, %v782_v35  ;;  %v741_v33 = vmul.f32 %v1244_v16, %v584_v40  ;;  %1164 = vmatpush.xpose.msk.msra.mxu0 %vm163_vm0, %v809_v11 }
 0x169   :  { %v635_v54 = vadd.f32 %v634_v20, %v633_v36  ;;  %v609_v9 = vpop.permute.xlu2 %608  ;;  %v721_v28 = vrot.slane %v720_v56, 2  ;;  %v625_v18 = vadd.f32 %v624_v4, %v623_v26  ;;  %v689_v59 = vadd.f32 %v688_v44, %v687_v31  ;;  %v1247_v26 = vld [vmem:[%s2089_s24 + $0x20] sm:$0xff] }
 0x16a   :  { %v699_v55 = vadd.f32 %v698_v52, %v697_v39  ;;  %v618_v1 = vmul.f32 %v1245_v21, %v609_v9  ;;  %v682_v23 = vmul.f32 %v609_v9, %v1636_v3  ;;  %v761_v58 = vsel %vm163_vm0, %v741_v33, 0.0  ;;  %1176 = vmatpush.xpose.msk.msra.mxu2 %vm163_vm0, %v934_v17  ;;  %v804_v3 = vld [vmem:[%s2070_s10 + $0x8] sm:$0xff]  ;;  %v803_v36 = vld [vmem:[%s2070_s10] sm:$0xff] }
 0x16b   :  { %v636_v32 = vrot.slane %v635_v54, 2  ;;  %v753_v24 = vadd.f32 %v752_v2, %v751_v60  ;;  %v762_v41 = vrot.slane %v761_v58, 4  ;;  %v785_v51 = vrot.slane %v784_v0, 2  ;;  %1170 = vmatpush.xpose.msk.msra.mxu1 %vm163_vm0, %v804_v3  ;;  %v1249_v20 = vld [vmem:[%s2090_s26 + $0x20] sm:$0xff]  ;;  %v1250_v3 = vld [vmem:[%s2089_s24 + $0x30] sm:$0xff] }
 0x16c   :  { %v668_v40 = vsel %vm163_vm0, %v618_v1, 0.0  ;;  %v732_v47 = vsel %vm163_vm0, %v682_v23, 0.0  ;;  %v746_v27 = vmul.f32 %v1246_v7, %v609_v9  ;;  %v658_v19 = vadd.f32 %v657_v15, %v656_v53  ;;  %v1248_v53 = vld [vmem:[%s2088_s1 + $0x20] sm:$0xff] }
 0x16d   :  { %v722_v37 = vadd.f32 %v721_v28, %v720_v56  ;;  %v700_v6 = vrot.slane %v699_v55, 2  ;;  %v763_v35 = vadd.f32 %v762_v41, %v761_v58  ;;  %v1946_v45 = vsel %vm823_vm3, %v632_v22, %v625_v18  ;;  %v932_v22 = vld [vmem:[%s2072_s12] sm:$0xff] }
 0x16e   :  { %v637_v46 = vadd.f32 %v636_v32, %v635_v54  ;;  %v796_v57 = vsel %vm163_vm0, %v746_v27, 0.0  ;;  %v1957_v8 = vsel %vm823_vm3, %v696_v49, %v689_v59  ;;  %v669_v31 = vrot.slane %v668_v40, 4  ;;  %1177 = vmatpush.xpose.msk.msra.mxu2 %vm163_vm0, %v933_v29 }
 0x16f   :  { %v764_v43 = vrot.slane %v763_v35, 2  ;;  %v733_v60 = vrot.slane %v732_v47, 4  ;;  %v1963_v48 = vadd.f32 %v785_v51, %v784_v0  ;;  %v659_v49 = vrot.slane %v658_v19, 1  ;;  %1171 = vmatpush.xpose.msk.msra.mxu1 %vm163_vm0, %v803_v36 }
 0x170   :  { %v723_v56 = vrot.slane %v722_v37, 1  ;;  %v701_v39 = vadd.f32 %v700_v6, %v699_v55  ;;  %v797_v63 = vrot.slane %v796_v57, 4  ;;  %v638_v4 = vrot.slane %v637_v46, 1 }
 0x171   :  { %v594_v14 = vpop.permute.xlu1 %593  ;;  %v765_v12 = vadd.f32 %v764_v43, %v763_v35  ;;  %v670_v44 = vadd.f32 %v669_v31, %v668_v40  ;;  %v734_v2 = vadd.f32 %v733_v60, %v732_v47  ;;  %v946_v13 = vsel %vm823_vm3, %v1900_v62, %v753_v24  ;;  %v1251_v40 = vld [vmem:[%s2088_s1 + $0x30] sm:$0xff] }
 0x172   :  { %v615_v42 = vmul.f32 %v1247_v26, %v594_v14  ;;  %v679_v61 = vmul.f32 %v1248_v53, %v594_v14  ;;  %v743_v30 = vmul.f32 %v1249_v20, %v594_v14  ;;  %1178 = vmatpush.xpose.msk.msra.mxu2 %vm163_vm0, %v932_v22  ;;  %v787_v15 = vrot.slane %v1963_v48, 1 }
 0x173   :  { %v1983_v33 = vadd.f32 %v659_v49, %v658_v19  ;;  %v702_v17 = vrot.slane %v701_v39, 1  ;;  %v798_v28 = vadd.f32 %v797_v63, %v796_v57  ;;  %v1985_v21 = vadd.f32 %v723_v56, %v722_v37  ;;  %v1252_v19 = vld [vmem:[%s2090_s26 + $0x30] sm:$0xff] }
 0x174   :  { %v647_v50 = vsel %vm163_vm0, %v615_v42, 0.0  ;;  %v711_v9 = vsel %vm163_vm0, %v679_v61, 0.0  ;;  %v775_v10 = vsel %vm163_vm0, %v743_v30, 0.0  ;;  %v639_v1 = vadd.f32 %v638_v4, %v637_v46 }
 0x175   :  { %v648_v54 = vrot.slane %v647_v50, 4  ;;  %v712_v52 = vrot.slane %v711_v9, 4  ;;  %v776_v16 = vrot.slane %v775_v10, 4  ;;  %v766_v32 = vrot.slane %v765_v12, 1 }
 0x176   :  { %v671_v58 = vrot.slane %v670_v44, 2  ;;  %v735_v38 = vrot.slane %v734_v2, 2  ;;  %v703_v7 = vadd.f32 %v702_v17, %v701_v39  ;;  %v799_v27 = vrot.slane %v798_v28, 2 }
 0x177   :  { %v649_v0 = vadd.f32 %v648_v54, %v647_v50  ;;  %v713_v55 = vadd.f32 %v712_v52, %v711_v9  ;;  %v777_v18 = vadd.f32 %v776_v16, %v775_v10  ;;  %v767_v43 = vadd.f32 %v766_v32, %v765_v12 }
 0x178   :  { %v736_v31 = vadd.f32 %v735_v38, %v734_v2  ;;  %v672_v50 = vadd.f32 %v671_v58, %v670_v44  ;;  %v826_v20 = vsel %vm825_vm4, %v703_v7, %v1957_v8  ;;  %v800_v30 = vadd.f32 %v799_v27, %v798_v28 }
 0x179   :  { %v650_v23 = vrot.slane %v649_v0, 2  ;;  %v714_v59 = vrot.slane %v713_v55, 2  ;;  %v778_v41 = vrot.slane %v777_v18, 2  ;;  %v886_v56 = vsel %vm825_vm4, %v639_v1, %v1946_v45 }
 0x17a   :  { %v737_v10 = vrot.slane %v736_v31, 1  ;;  %v947_v12 = vsel %vm825_vm4, %v767_v43, %v946_v13  ;;  %v828_v8 = vsel %vm827_vm5, %v1923_v25, %v826_v20  ;;  %v887_v52 = vsel %vm827_vm5, %v1910_v5, %v886_v56  ;;  %v1035_v20 = vld [vmem:[%s2075_s15 + $0x8] sm:$0xff] }
 0x17b   :  { %v604_v62 = vpop.permute.xlu1 %603  ;;  %v651_v24 = vadd.f32 %v650_v23, %v649_v0  ;;  %v715_v29 = vadd.f32 %v714_v59, %v713_v55  ;;  %v779_v35 = vadd.f32 %v778_v41, %v777_v18  ;;  %v673_v16 = vrot.slane %v672_v50, 1 }
 0x17c   :  { %v617_v51 = vmul.f32 %v1250_v3, %v604_v62  ;;  %v681_v47 = vmul.f32 %v1251_v40, %v604_v62  ;;  %v745_v37 = vmul.f32 %v1252_v19, %v604_v62  ;;  %v801_v17 = vrot.slane %v800_v30, 1  ;;  %v1253_v19 = vld [vmem:[#allocation2] sm:$0xff] }
 0x17d   :  { %v652_v6 = vrot.slane %v651_v24, 1  ;;  %v716_v57 = vrot.slane %v715_v29, 1  ;;  %v780_v60 = vrot.slane %v779_v35, 1  ;;  %v948_v13 = vsel %vm827_vm5, %v1930_v34, %v947_v12 }
 0x17e   :  { %v661_v14 = vsel %vm163_vm0, %v617_v51, 0.0  ;;  %v725_v46 = vsel %vm163_vm0, %v681_v47, 0.0  ;;  %v789_v11 = vsel %vm163_vm0, %v745_v37, 0.0  ;;  %v788_v23 = vadd.f32 %v787_v15, %v1963_v48 }
 0x17f   :  { %v662_v26 = vrot.slane %v661_v14, 4  ;;  %v726_v42 = vrot.slane %v725_v46, 4  ;;  %v790_v36 = vrot.slane %v789_v11, 4  ;;  %v653_v22 = vadd.f32 %v652_v6, %v651_v24 }
 0x180   :  { %v717_v39 = vadd.f32 %v716_v57, %v715_v29  ;;  %v781_v54 = vadd.f32 %v780_v60, %v779_v35  ;;  %v738_v32 = vadd.f32 %v737_v10, %v736_v31  ;;  %v674_v59 = vadd.f32 %v673_v16, %v672_v50 }
 0x181   :  { %v663_v53 = vadd.f32 %v662_v26, %v661_v14  ;;  %v727_v61 = vadd.f32 %v726_v42, %v725_v46  ;;  %v791_v49 = vadd.f32 %v790_v36, %v789_v11  ;;  %v888_v45 = vsel %vm829_vm6, %v653_v22, %v887_v52  ;;  %v1034_v22 = vld [vmem:[%s2075_s15] sm:$0xff] }
 0x182   :  { %v830_v55 = vsel %vm829_vm6, %v717_v39, %v828_v8  ;;  %v949_v5 = vsel %vm829_vm6, %v781_v54, %v948_v13  ;;  %v889_v62 = vsel %vm831_vm7, %v1983_v33, %v888_v45  ;;  %v802_v15 = vadd.f32 %v801_v17, %v800_v30  ;;  %v106_v30 = vld [vmem:[#allocation5] sm:$0xff]  ;;  %v1205_v52 = vld [vmem:[%s2074_s14] ss:$0 sm:$0xff]  ;;  %v1098_v45 = vld [vmem:[#allocation7 + $0x8] sm:$0xff] }
 0x183   :  { %v664_v63 = vrot.slane %v663_v53, 2  ;;  %v728_v4 = vrot.slane %v727_v61, 2  ;;  %v792_v9 = vrot.slane %v791_v49, 2  ;;  %v832_v38 = vsel %vm831_vm7, %v1985_v21, %v830_v55  ;;  %v1097_v17 = vld [vmem:[#allocation7] sm:$0xff] }
 0x184   :  { %v950_v41 = vsel %vm831_vm7, %v788_v23, %v949_v5  ;;  %v1362_v35 = vmov 48.0  }
 0x185   :  { %v665_v44 = vadd.f32 %v664_v63, %v663_v53  ;;  %v729_v2 = vadd.f32 %v728_v4, %v727_v61  ;;  %v793_v0 = vadd.f32 %v792_v9, %v791_v49  ;;  %1238 = vrcp.f32 %v1362_v35  ;;  %v1037_v53 = vld [vmem:[%s2076_s16 + $0x8] sm:$0xff]  ;;  %v1036_v61 = vld [vmem:[%s2076_s16] sm:$0xff] }
 0x186   :  { %1180 = vmatpush.xpose.msk.msra.mxu3 %vm163_vm0, %v1037_v53 }
 0x187   :  { %v730_v28 = vrot.slane %v729_v2, 1  ;;  %v666_v1 = vrot.slane %v665_v44, 1  ;;  %v794_v25 = vrot.slane %v793_v0, 1 }
 0x189   :  { %v731_v18 = vadd.f32 %v730_v28, %v729_v2  ;;  %v667_v58 = vadd.f32 %v666_v1, %v665_v44  ;;  %v795_v34 = vadd.f32 %v794_v25, %v793_v0  ;;  %v1204_v44 = vld [vmem:[%s2073_s13] ss:$0 sm:$0xff]  ;;  %s1363_s13 = smov [#allocation8]  }
 0x18a   :  { %1181 = vmatpush.xpose.msk.msra.mxu3 %vm163_vm0, %v1036_v61  ;;  %s1142_s30 = sshll.u32 %s1363_s13, 4  ;;  %s1143_s30 = int_to_ptr.vmem [resolvable:$true] %s1142_s30 }
 0x18b   :  { %v834_v24 = vsel %vm833_vm8, %v731_v18, %v832_v38  ;;  %v890_v48 = vsel %vm833_vm8, %v667_v58, %v889_v62  ;;  %v951_v40 = vsel %vm833_vm8, %v795_v34, %v950_v41  ;;  %v1239_v14 = vpop.eup %1238 }
 0x18c   :  { %v836_v3 = vsel %vm835_vm9, %v738_v32, %v834_v24  ;;  %v891_v51 = vsel %vm835_vm9, %v674_v59, %v890_v48  ;;  %v952_v21 = vsel %vm835_vm9, %v802_v15, %v951_v40  ;;  %v999_v46 = vmul.f32 48.0, %v1239_v14 }
 0x18d   :  { %1165 = vmatmul.msk.f32.vlgmr.msra.gmra.mxu0 %vm163_vm0, %v836_v3  ;;  %1172 = vmatmul.msk.f32.vlgmr.msra.gmra.mxu1 %vm163_vm0, %v891_v51  ;;  %vm1003_vm10 = vweird.f32 %v1239_v14 }
 0x18e   :  { %1179 = vmatmul.msk.f32.vlgmr.msra.gmra.mxu2 %vm163_vm0, %v952_v21  ;;  %v1000_v57 = vsub.f32 1.0, %v999_v46  ;;  %1183 = vmatpush.xpose.msk.msrb.mxu3 %vm123_vm1, %v1035_v20 }
 0x18f   :  { %1182 = vmatmul.msk.f32.vlgmr.msra.gmra.mxu3 %vm163_vm0, %v106_v30 }
 0x190   :  { %v1001_v26 = vmul.f32 %v1239_v14, %v1000_v57 }
 0x192   :  { %v1002_v42 = vadd.f32 %v1239_v14, %v1001_v26  ;;  %1184 = vmatpush.xpose.msk.msrb.mxu3 %vm123_vm1, %v1034_v22 }
 0x194   :  { %v1004_v11 = vsel %vm1003_vm10, %v1239_v14, %v1002_v42 }
 0x196   :  { %1186 = vmatpush.xpose.msk.msra.mxu3 %vm163_vm0, %v1098_v45 }
 0x19a   :  { %1187 = vmatpush.xpose.msk.msra.mxu3 %vm163_vm0, %v1097_v17 }
 0x20a   :  { %v874_v33 = vpop.f32.mrf.mxu0  ;;  %v929_v47 = vpop.f32.mrf.mxu1 }
 0x20b   :  { %v930_v7 = vadd.f32 %v929_v47, %v874_v33 }
 0x211   :  { %v990_v27 = vpop.f32.mrf.mxu2 }
 0x212   :  { %v993_v29 = vadd.f32 %v990_v27, %v930_v7  ;;  %v1064_v28 = vpop.f32.mrf.mxu3 }
 0x214   :  { %v994_v37 = vadd.f32 %v1253_v19, %v993_v29 }
 0x216   :  { %v995_v6 = vsel %vm123_vm1, %v994_v37, 0.0 }
 0x217   :  { %996 = vadd.xlane.f32.xlu1 %v995_v6 }
 0x28a   :  { %v997_v43 = vpop.xlane.xlu1 %996 }
 0x28b   :  { %v1005_v31 = vmul.f32 %v1004_v11, %v997_v43 }
 0x28d   :  { %v1006_v60 = vsub.f32 %v994_v37, %v1005_v31 }
 0x28f   :  { %v1007_v36 = vmul.f32 %v1006_v60, %v1006_v60 }
 0x291   :  { %v1008_v50 = vsel %vm123_vm1, %v1007_v36, 0.0 }
 0x292   :  { %1009 = vadd.xlane.f32.xlu0 %v1008_v50 }
 0x305   :  { %v1010_v49 = vpop.xlane.xlu0 %1009 }
 0x306   :  { %v1011_v56 = vmul.f32 %v1010_v49, %v1004_v11 }
 0x308   :  { %v1012_v39 = vadd.f32 1e-05, %v1011_v56 }
 0x30a   :  { %1240 = vrsqrt.f32 %v1012_v39  ;;  %vm1019_vm12 = vweird.f32 %v1012_v39 }
 0x310   :  { %v1241_v63 = vpop.eup %1240 }
 0x311   :  { %v1014_v4 = vmul.f32 %v1241_v63, %v1012_v39  ;;  %vm1020_vm11 = vweird.f32 %v1241_v63 }
 0x312   :  { %vm1021_vm13 = vmor %vm1019_vm12, %vm1020_vm11 }
 0x313   :  { %v1015_v54 = vmul.f32 %v1241_v63, %v1014_v4 }
 0x315   :  { %v1016_v9 = vmul.f32 0.5, %v1015_v54 }
 0x317   :  { %v1017_v10 = vsub.f32 1.5, %v1016_v9 }
 0x319   :  { %v1018_v12 = vmul.f32 %v1241_v63, %v1017_v10 }
 0x31b   :  { %v1022_v2 = vsel %vm1021_vm13, %v1241_v63, %v1018_v12 }
 0x31c   :  { %v1023_v8 = vmul.f32 %v1022_v2, %v1006_v60 }
 0x31e   :  { %v1028_v0 = vmul.f32 %v1204_v44, %v1023_v8 }
 0x320   :  { %v1033_v16 = vadd.f32 %v1205_v52, %v1028_v0 }
 0x322   :  { %1185 = vmatmul.msk.f32.vlgmr.msrb.gmra.mxu3 %vm123_vm1, %v1033_v16 }
 0x3a5   :  { %v1093_v55 = vpop.f32.mrf.mxu3 }
 0x3a6   :  { %v1094_v1 = vadd.f32 %v1093_v55, %v1064_v28 }
 0x3a8   :  { %v1096_v13 = vmax.f32 %v1094_v1, 0.0 }
 0x3aa   :  { %1188 = vmatmul.msk.f32.vlgmr.msra.gmra.mxu3 %vm163_vm0, %v1096_v13 }
 0x42d   :  { %v1125_v23 = vpop.f32.mrf.mxu3 }
 0x42e   :  { %1128 = vst.msk [vmem:[#allocation8] sm:$0xff] %vm163_vm0, %v1125_v23 }
 0x42f   :  { %1147 = dma.vmem_to_hbm [thread:$0]  %s1143_s30, 128, %s1145_s4, [#allocation4]  }
 0x430   :  { %1354 = dma.done.wait [#allocation4], 128  }
 0x431   :  { %1355 = vsyncadd [#allocation4], 4294967168 }
 0x432   :  { %1156 = vsyncpa [#allocation3], 1 }
 0x433   :  { %1157 = vsyncpa [#allocation6], 1 }
 0x434   :  { %1158 = vsyncpa [#allocation4], 1 }

</bundles_post_ra>
